<compile_context>
chip_gen: v6e
topology: v6e:2x2x1
jax: 0.10.0
libtpu: 0.0.40
codegen_flags: <defaults>
</compile_context>

<pallas_src>
import functools

import jax
import jax.numpy as jnp
import numpy as np
from jax import lax
from jax.experimental import pallas as pl
from jax.experimental.pallas import tpu as pltpu


# --------------------------------------------------------------------------- #
# Pallas kernel: full greedy decode loop (eval branch)
# --------------------------------------------------------------------------- #
def make_leap_kernel(L, E, V, max_len, sos_token):
    """Returns a kernel closing over the static sizes.

    Ref arguments (all VMEM, full arrays):
      enc_ref     [L, E]     encoder embeddings of input[0]   (eval: no dropout)
      dec_tbl_ref [V, 1, E]  decoder embedding table (voc_size[2] + 2 rows)
      awh_ref     [E, 1]     attn weight acting on the (repeated) hidden state
      awx_ref     [E, 1]     attn weight acting on the encoder embeddings
      ab_ref      [1, 1]     attn bias
      wih_c_ref   [E, 3E]    GRU W_ih slice acting on the attention context
      wih_d_ref   [E, 3E]    GRU W_ih slice acting on the decoder-token embedding
      bih_ref     [1, 3E]    GRU b_ih
      whh_ref     [E, 3E]    GRU W_hh
      bhh_ref     [1, 3E]    GRU b_hh
      ow_ref      [E, V]     output projection weight
      ob_ref      [1, V]     output projection bias
      out_ref     [max_len, V]  softmax probabilities per decode step (output)
    """

    def kernel(enc_ref, dec_tbl_ref, awh_ref, awx_ref, ab_ref,
               wih_c_ref, wih_d_ref, bih_ref, whh_ref, bhh_ref,
               ow_ref, ob_ref, out_ref):
        enc = enc_ref[...]            # [L, E]
        awh = awh_ref[...]            # [E, 1]
        awx = awx_ref[...]            # [E, 1]
        ab = ab_ref[...]              # [1, 1]
        wih_d = wih_d_ref[...]        # [E, 3E]
        whh = whh_ref[...]            # [E, 3E]
        bhh = bhh_ref[...]            # [1, 3E]
        ow = ow_ref[...]              # [E, V]
        ob = ob_ref[...]              # [1, V]

        lane_ids = lax.broadcasted_iota(jnp.int32, (1, V), 1)

        # ---------------- hoisted, loop-invariant work ---------------- #
        # Step 0 always starts from the SOS token, so the decoder embedding and
        # the hidden-state init are statically known.
        dec_emb_sos = dec_tbl_ref[sos_token]                              # [1, E]
        hidden = dec_emb_sos                                              # [1, E]

        # Attention over the encoder embeddings.  In the reference code
        # input_embedding collapses to a single row after step 0, and a softmax
        # over one element is exactly 1.0, so the context is identical for all
        # di >= 1 -> compute it ONCE (bit-exact with the reference).
        s = (jnp.dot(enc, awx, preferred_element_type=jnp.float32)
             + jnp.dot(hidden, awh, preferred_element_type=jnp.float32)
             + ab)                                                        # [L, 1]
        s = s - jnp.max(s, axis=0, keepdims=True)
        p = jnp.exp(s)
        p = p / jnp.sum(p, axis=0, keepdims=True)                         # [L, 1]
        ctx = jnp.sum(p * enc, axis=0, keepdims=True)                     # [1, E]

        # Loop-invariant part of the GRU input gates: ctx @ W_ih[:E] + b_ih.
        gi_ctx = (jnp.dot(ctx, wih_c_ref[...],
                          preferred_element_type=jnp.float32)
                  + bih_ref[...])                                         # [1, 3E]

        # ---------------- fully-unrolled greedy decode ---------------- #
        dec_emb = dec_emb_sos
        for di in range(max_len):
            # GRU cell (PyTorch gate ordering: r, z, n)
            gi = gi_ctx + jnp.dot(dec_emb, wih_d,
                                  preferred_element_type=jnp.float32)     # [1, 3E]
            gh = jnp.dot(hidden, whh,
                         preferred_element_type=jnp.float32) + bhh        # [1, 3E]
            r = jax.nn.sigmoid(gi[:, 0:E] + gh[:, 0:E])
            z = jax.nn.sigmoid(gi[:, E:2 * E] + gh[:, E:2 * E])
            n = jnp.tanh(gi[:, 2 * E:3 * E] + r * gh[:, 2 * E:3 * E])
            hidden = (1.0 - z) * n + z * hidden                           # [1, E]

            # output projection + softmax
            logits = jnp.dot(jax.nn.relu(hidden), ow,
                             preferred_element_type=jnp.float32) + ob     # [1, V]
            m = jnp.max(logits, axis=-1, keepdims=True)
            e = jnp.exp(logits - m)
            probs = e / jnp.sum(e, axis=-1, keepdims=True)

            out_ref[pl.ds(di, 1), :] = probs

            # greedy argmax (first max index, matches torch.topk(1)) and the
            # next decoder-token embedding via a dynamic VMEM row load.
            if di + 1 < max_len:
                next_tok = jnp.min(jnp.where(logits == m, lane_ids, V),
                                   axis=-1)[0]
                dec_emb = dec_tbl_ref[next_tok]                           # [1, E]

    return kernel


# --------------------------------------------------------------------------- #
# Wrapper (plain-JAX glue: embedding gather, weight splitting, pallas_call)
# --------------------------------------------------------------------------- #
@functools.partial(jax.jit, static_argnames=("max_len", "sos_token"))
def leap_forward_pallas(params, input_ids, *, max_len, sos_token):
    # eval-mode nn.Dropout(0.3) is identity -> encoder embedding is a lookup
    enc_emb = params["enc_table"][input_ids].astype(jnp.float32)   # [L, E]
    L, E = enc_emb.shape
    V = params["dec_table"].shape[0]

    attn_w = params["attn_w"]                                # [2E, 1]
    awh, awx = attn_w[:E], attn_w[E:]                        # hidden part / enc part
    w_ih = params["w_ih"]                                    # [2E, 3E]
    wih_c, wih_d = w_ih[:E], w_ih[E:]                        # context part / dec-emb part

    # [V, 1, E]: leading-axis dynamic indexing inside the kernel.
    dec_tbl_3d = params["dec_table"].astype(jnp.float32).reshape(V, 1, E)

    args = (
        enc_emb,
        dec_tbl_3d,
        awh, awx, params["attn_b"].reshape(1, 1),
        wih_c, wih_d, params["b_ih"].reshape(1, 3 * E),
        params["w_hh"], params["b_hh"].reshape(1, 3 * E),
        params["out_w"], params["out_b"].reshape(1, V),
    )

    kernel = make_leap_kernel(L, E, V, max_len, sos_token)
    vmem = lambda: pl.BlockSpec(memory_space=pltpu.MemorySpace.VMEM)

    return pl.pallas_call(
        kernel,
        out_shape=jax.ShapeDtypeStruct((max_len, V), jnp.float32),
        in_specs=[vmem() for _ in args],
        out_specs=vmem(),
    )(*args)


# --------------------------------------------------------------------------- #
# Pure-numpy reference mirroring the PyTorch eval forward literally
# --------------------------------------------------------------------------- #
def leap_forward_ref(params, input_ids, *, max_len, sos_token):
    E = params["enc_table"].shape[1]
    input_embedding = np.asarray(params["enc_table"])[np.asarray(input_ids)]  # [L, E]
    dec_tbl = np.asarray(params["dec_table"])
    attn_w = np.asarray(params["attn_w"]); attn_b = np.asarray(params["attn_b"])
    w_ih = np.asarray(params["w_ih"]); b_ih = np.asarray(params["b_ih"])
    w_hh = np.asarray(params["w_hh"]); b_hh = np.asarray(params["b_hh"])
    out_w = np.asarray(params["out_w"]); out_b = np.asarray(params["out_b"])

    def sigmoid(x):
        return 1.0 / (1.0 + np.exp(-x))

    def softmax(x, axis):
        x = x - x.max(axis=axis, keepdims=True)
        e = np.exp(x)
        return e / e.sum(axis=axis, keepdims=True)

    hidden = None
    token = sos_token
    outs = []
    for di in range(max_len):
        dec_emb = dec_tbl[token][None, :]                                  # [1, E]
        if hidden is None:
            hidden = dec_emb
        Lc = input_embedding.shape[0]
        hrep = np.broadcast_to(hidden, (Lc, E))
        combined = np.concatenate([hrep, input_embedding], axis=-1)        # [Lc, 2E]
        attn_weight = softmax((combined @ attn_w + attn_b).T, axis=-1)     # [1, Lc]
        input_embedding = attn_weight @ input_embedding                    # [1, E]
        x = np.concatenate([input_embedding, dec_emb], axis=-1)            # [1, 2E]
        gi = x @ w_ih + b_ih
        gh = hidden @ w_hh + b_hh
        r = sigmoid(gi[:, :E] + gh[:, :E])
        z = sigmoid(gi[:, E:2 * E] + gh[:, E:2 * E])
        n = np.tanh(gi[:, 2 * E:] + r * gh[:, 2 * E:])
        hidden = (1.0 - z) * n + z * hidden
        logits = np.maximum(hidden, 0.0) @ out_w + out_b                   # [1, V]
        outs.append(softmax(logits, axis=-1))
        token = int(np.argmax(logits))
    return np.concatenate(outs, axis=0)


# --------------------------------------------------------------------------- #
if __name__ == "__main__":
    # small, deterministic synthetic setup consistent with Leap.__init__
    voc_size = (20, 15, 10)          # enc vocab, (unused), med vocab
    EMB = 32                         # emb_dim
    SOS = voc_size[2]                # 10
    V_DEC = voc_size[2] + 2          # dec embedding rows / output classes = 12
    L = 6                            # number of diagnosis codes in input[0]
    MAX_LEN = 8

    key = jax.random.PRNGKey(0)
    ks = jax.random.split(key, 11)
    sc = 0.1
    params = {
        "enc_table": jax.random.normal(ks[0], (voc_size[0], EMB), jnp.float32) * sc,
        "dec_table": jax.random.normal(ks[1], (V_DEC, EMB), jnp.float32) * sc,
        "attn_w":    jax.random.normal(ks[2], (2 * EMB, 1), jnp.float32) * sc,
        "attn_b":    jax.random.normal(ks[3], (1,), jnp.float32) * sc,
        "w_ih":      jax.random.normal(ks[4], (2 * EMB, 3 * EMB), jnp.float32) * sc,
        "b_ih":      jax.random.normal(ks[5], (3 * EMB,), jnp.float32) * sc,
        "w_hh":      jax.random.normal(ks[6], (EMB, 3 * EMB), jnp.float32) * sc,
        "b_hh":      jax.random.normal(ks[7], (3 * EMB,), jnp.float32) * sc,
        "out_w":     jax.random.normal(ks[8], (EMB, V_DEC), jnp.float32) * sc,
        "out_b":     jax.random.normal(ks[9], (V_DEC,), jnp.float32) * sc,
    }
    input_ids = jax.random.randint(ks[10], (L,), 0, voc_size[0], dtype=jnp.int32)

    probs = leap_forward_pallas(params, input_ids, max_len=MAX_LEN, sos_token=SOS)
    probs = jax.block_until_ready(probs)

    ref = leap_forward_ref(params, input_ids, max_len=MAX_LEN, sos_token=SOS)
    np.testing.assert_allclose(np.asarray(probs), ref, atol=1e-4, rtol=1e-4)

    print("KERNEL_OK")
</pallas_src>

<mosaic_0001>
module attributes {stable_mosaic.version = 11 : i64} {
  func.func @kernel(%arg0: memref<6x32xf32, #tpu.memory_space<vmem>>, %arg1: memref<12x1x32xf32, #tpu.memory_space<vmem>>, %arg2: memref<32x1xf32, #tpu.memory_space<vmem>>, %arg3: memref<32x1xf32, #tpu.memory_space<vmem>>, %arg4: memref<1x1xf32, #tpu.memory_space<vmem>>, %arg5: memref<32x96xf32, #tpu.memory_space<vmem>>, %arg6: memref<32x96xf32, #tpu.memory_space<vmem>>, %arg7: memref<1x96xf32, #tpu.memory_space<vmem>>, %arg8: memref<32x96xf32, #tpu.memory_space<vmem>>, %arg9: memref<1x96xf32, #tpu.memory_space<vmem>>, %arg10: memref<32x12xf32, #tpu.memory_space<vmem>>, %arg11: memref<1x12xf32, #tpu.memory_space<vmem>>, %arg12: memref<8x12xf32, #tpu.memory_space<vmem>>) attributes {dimension_semantics = [], scalar_prefetch = 0 : i64, scratch_operands = 0 : i64, tpu.core_type = #tpu.core_type<tc>} {
    %c0 = arith.constant 0 : index
    %c0_0 = arith.constant 0 : index
    %0 = vector.load %arg0[%c0, %c0_0] : memref<6x32xf32, #tpu.memory_space<vmem>>, vector<6x32xf32>
    %c0_1 = arith.constant 0 : index
    %c0_2 = arith.constant 0 : index
    %1 = vector.load %arg2[%c0_1, %c0_2] : memref<32x1xf32, #tpu.memory_space<vmem>>, vector<32x1xf32>
    %c0_3 = arith.constant 0 : index
    %c0_4 = arith.constant 0 : index
    %2 = vector.load %arg3[%c0_3, %c0_4] : memref<32x1xf32, #tpu.memory_space<vmem>>, vector<32x1xf32>
    %c0_5 = arith.constant 0 : index
    %c0_6 = arith.constant 0 : index
    %3 = vector.load %arg4[%c0_5, %c0_6] : memref<1x1xf32, #tpu.memory_space<vmem>>, vector<1x1xf32>
    %c0_7 = arith.constant 0 : index
    %c0_8 = arith.constant 0 : index
    %4 = vector.load %arg6[%c0_7, %c0_8] : memref<32x96xf32, #tpu.memory_space<vmem>>, vector<32x96xf32>
    %c0_9 = arith.constant 0 : index
    %c0_10 = arith.constant 0 : index
    %5 = vector.load %arg8[%c0_9, %c0_10] : memref<32x96xf32, #tpu.memory_space<vmem>>, vector<32x96xf32>
    %c0_11 = arith.constant 0 : index
    %c0_12 = arith.constant 0 : index
    %6 = vector.load %arg9[%c0_11, %c0_12] : memref<1x96xf32, #tpu.memory_space<vmem>>, vector<1x96xf32>
    %c0_13 = arith.constant 0 : index
    %c0_14 = arith.constant 0 : index
    %7 = vector.load %arg10[%c0_13, %c0_14] : memref<32x12xf32, #tpu.memory_space<vmem>>, vector<32x12xf32>
    %c0_15 = arith.constant 0 : index
    %c0_16 = arith.constant 0 : index
    %8 = vector.load %arg11[%c0_15, %c0_16] : memref<1x12xf32, #tpu.memory_space<vmem>>, vector<1x12xf32>
    %9 = tpu.iota {dimensions = array<i32: 1>} : vector<1x12xi32>
    %c10 = arith.constant 10 : index
    %c0_17 = arith.constant 0 : index
    %c0_18 = arith.constant 0 : index
    %10 = vector.load %arg1[%c10, %c0_17, %c0_18] : memref<12x1x32xf32, #tpu.memory_space<vmem>>, vector<1x1x32xf32>
    %11 = vector.shape_cast %10 : vector<1x1x32xf32> to vector<1x32xf32>
    %cst = arith.constant dense<0.000000e+00> : vector<6x1xf32>
    %12 = tpu.matmul %0, %2, %cst {dimension_numbers = #tpu.dot_dimension_numbers<[1], [0], [0], [1], [0, 0, 1, 1], [], []>} : vector<6x32xf32>, vector<32x1xf32>, vector<6x1xf32> -> vector<6x1xf32>
    %cst_19 = arith.constant dense<0.000000e+00> : vector<1x1xf32>
    %13 = tpu.matmul %11, %1, %cst_19 {dimension_numbers = #tpu.dot_dimension_numbers<[1], [0], [0], [1], [0, 0, 1, 1], [], []>} : vector<1x32xf32>, vector<32x1xf32>, vector<1x1xf32> -> vector<1x1xf32>
    %14 = vector.broadcast %13 : vector<1x1xf32> to vector<6x1xf32>
    %15 = arith.addf %12, %14 : vector<6x1xf32>
    %16 = vector.broadcast %3 : vector<1x1xf32> to vector<6x1xf32>
    %17 = arith.addf %15, %16 : vector<6x1xf32>
    %cst_20 = arith.constant dense<0xFF800000> : vector<1xf32>
    %18 = vector.multi_reduction <maximumf>, %17, %cst_20 [0] : vector<6x1xf32> to vector<1xf32>
    %19 = vector.shape_cast %18 : vector<1xf32> to vector<1x1xf32>
    %20 = vector.broadcast %19 : vector<1x1xf32> to vector<6x1xf32>
    %21 = arith.subf %17, %20 : vector<6x1xf32>
    %22 = math.exp %21 : vector<6x1xf32>
    %cst_21 = arith.constant dense<0.000000e+00> : vector<1xf32>
    %23 = vector.multi_reduction <add>, %22, %cst_21 [0] : vector<6x1xf32> to vector<1xf32>
    %24 = vector.shape_cast %23 : vector<1xf32> to vector<1x1xf32>
    %25 = vector.broadcast %24 : vector<1x1xf32> to vector<6x1xf32>
    %26 = arith.divf %22, %25 : vector<6x1xf32>
    %27 = vector.broadcast %26 : vector<6x1xf32> to vector<6x32xf32>
    %28 = arith.mulf %27, %0 : vector<6x32xf32>
    %cst_22 = arith.constant dense<0.000000e+00> : vector<32xf32>
    %29 = vector.multi_reduction <add>, %28, %cst_22 [0] : vector<6x32xf32> to vector<32xf32>
    %30 = vector.shape_cast %29 : vector<32xf32> to vector<1x32xf32>
    %c0_23 = arith.constant 0 : index
    %c0_24 = arith.constant 0 : index
    %31 = vector.load %arg5[%c0_23, %c0_24] : memref<32x96xf32, #tpu.memory_space<vmem>>, vector<32x96xf32>
    %cst_25 = arith.constant dense<0.000000e+00> : vector<1x96xf32>
    %32 = tpu.matmul %30, %31, %cst_25 {dimension_numbers = #tpu.dot_dimension_numbers<[1], [0], [0], [1], [0, 0, 1, 1], [], []>} : vector<1x32xf32>, vector<32x96xf32>, vector<1x96xf32> -> vector<1x96xf32>
    %c0_26 = arith.constant 0 : index
    %c0_27 = arith.constant 0 : index
    %33 = vector.load %arg7[%c0_26, %c0_27] : memref<1x96xf32, #tpu.memory_space<vmem>>, vector<1x96xf32>
    %34 = arith.addf %32, %33 : vector<1x96xf32>
    %cst_28 = arith.constant dense<0.000000e+00> : vector<1x96xf32>
    %35 = tpu.matmul %11, %4, %cst_28 {dimension_numbers = #tpu.dot_dimension_numbers<[1], [0], [0], [1], [0, 0, 1, 1], [], []>} : vector<1x32xf32>, vector<32x96xf32>, vector<1x96xf32> -> vector<1x96xf32>
    %36 = arith.addf %34, %35 : vector<1x96xf32>
    %cst_29 = arith.constant dense<0.000000e+00> : vector<1x96xf32>
    %37 = tpu.matmul %11, %5, %cst_29 {dimension_numbers = #tpu.dot_dimension_numbers<[1], [0], [0], [1], [0, 0, 1, 1], [], []>} : vector<1x32xf32>, vector<32x96xf32>, vector<1x96xf32> -> vector<1x96xf32>
    %38 = arith.addf %37, %6 : vector<1x96xf32>
    %39 = vector.extract_strided_slice %36 {offsets = [0, 0], sizes = [1, 32], strides = [1, 1]} : vector<1x96xf32> to vector<1x32xf32>
    %40 = vector.extract_strided_slice %38 {offsets = [0, 0], sizes = [1, 32], strides = [1, 1]} : vector<1x96xf32> to vector<1x32xf32>
    %41 = arith.addf %39, %40 : vector<1x32xf32>
    %42 = arith.negf %41 : vector<1x32xf32>
    %43 = math.exp %42 : vector<1x32xf32>
    %cst_30 = arith.constant 1.000000e+00 : f32
    %44 = vector.broadcast %cst_30 : f32 to vector<1x32xf32>
    %45 = arith.addf %44, %43 : vector<1x32xf32>
    %46 = arith.divf %44, %45 : vector<1x32xf32>
    %47 = vector.extract_strided_slice %36 {offsets = [0, 32], sizes = [1, 32], strides = [1, 1]} : vector<1x96xf32> to vector<1x32xf32>
    %48 = vector.extract_strided_slice %38 {offsets = [0, 32], sizes = [1, 32], strides = [1, 1]} : vector<1x96xf32> to vector<1x32xf32>
    %49 = arith.addf %47, %48 : vector<1x32xf32>
    %50 = arith.negf %49 : vector<1x32xf32>
    %51 = math.exp %50 : vector<1x32xf32>
    %cst_31 = arith.constant 1.000000e+00 : f32
    %52 = vector.broadcast %cst_31 : f32 to vector<1x32xf32>
    %53 = arith.addf %52, %51 : vector<1x32xf32>
    %54 = arith.divf %52, %53 : vector<1x32xf32>
    %55 = vector.extract_strided_slice %36 {offsets = [0, 64], sizes = [1, 32], strides = [1, 1]} : vector<1x96xf32> to vector<1x32xf32>
    %56 = vector.extract_strided_slice %38 {offsets = [0, 64], sizes = [1, 32], strides = [1, 1]} : vector<1x96xf32> to vector<1x32xf32>
    %57 = arith.mulf %46, %56 : vector<1x32xf32>
    %58 = arith.addf %55, %57 : vector<1x32xf32>
    %59 = math.tanh %58 : vector<1x32xf32>
    %cst_32 = arith.constant 1.000000e+00 : f32
    %60 = vector.broadcast %cst_32 : f32 to vector<1x32xf32>
    %61 = arith.subf %60, %54 : vector<1x32xf32>
    %62 = arith.mulf %61, %59 : vector<1x32xf32>
    %63 = arith.mulf %54, %11 : vector<1x32xf32>
    %64 = arith.addf %62, %63 : vector<1x32xf32>
    %cst_33 = arith.constant 0.000000e+00 : f32
    %65 = vector.broadcast %cst_33 : f32 to vector<1x32xf32>
    %66 = arith.maximumf %64, %65 : vector<1x32xf32>
    %cst_34 = arith.constant dense<0.000000e+00> : vector<1x12xf32>
    %67 = tpu.matmul %66, %7, %cst_34 {dimension_numbers = #tpu.dot_dimension_numbers<[1], [0], [0], [1], [0, 0, 1, 1], [], []>} : vector<1x32xf32>, vector<32x12xf32>, vector<1x12xf32> -> vector<1x12xf32>
    %68 = arith.addf %67, %8 : vector<1x12xf32>
    %cst_35 = arith.constant dense<0xFF800000> : vector<1xf32>
    %69 = vector.multi_reduction <maximumf>, %68, %cst_35 [1] : vector<1x12xf32> to vector<1xf32>
    %70 = vector.shape_cast %69 : vector<1xf32> to vector<1x1xf32>
    %71 = vector.broadcast %70 : vector<1x1xf32> to vector<1x12xf32>
    %72 = arith.subf %68, %71 : vector<1x12xf32>
    %73 = math.exp %72 : vector<1x12xf32>
    %cst_36 = arith.constant dense<0.000000e+00> : vector<1xf32>
    %74 = vector.multi_reduction <add>, %73, %cst_36 [1] : vector<1x12xf32> to vector<1xf32>
    %75 = vector.shape_cast %74 : vector<1xf32> to vector<1x1xf32>
    %76 = vector.broadcast %75 : vector<1x1xf32> to vector<1x12xf32>
    %77 = arith.divf %73, %76 : vector<1x12xf32>
    %c0_37 = arith.constant 0 : index
    %c0_38 = arith.constant 0 : index
    %78 = vector.load %arg12[%c0_37, %c0_38] : memref<8x12xf32, #tpu.memory_space<vmem>>, vector<1x12xf32>
    tpu.vector_store %arg12[%c0_37, %c0_38], %77 {strides = array<i32>} : memref<8x12xf32, #tpu.memory_space<vmem>>, vector<1x12xf32>,
    %79 = vector.broadcast %70 : vector<1x1xf32> to vector<1x12xf32>
    %80 = arith.cmpf oeq, %68, %79 : vector<1x12xf32>
    %c12_i32 = arith.constant 12 : i32
    %81 = vector.broadcast %c12_i32 : i32 to vector<1x12xi32>
    %82 = arith.select %80, %9, %81 : vector<1x12xi1>, vector<1x12xi32>
    %cst_39 = arith.constant dense<2147483647> : vector<1xi32>
    %83 = vector.multi_reduction <minsi>, %82, %cst_39 [1] : vector<1x12xi32> to vector<1xi32>
    %84 = vector.extract %83[0] : i32 from vector<1xi32>
    %85 = arith.index_cast %84 : i32 to index
    %c0_40 = arith.constant 0 : index
    %c0_41 = arith.constant 0 : index
    %86 = vector.load %arg1[%85, %c0_40, %c0_41] : memref<12x1x32xf32, #tpu.memory_space<vmem>>, vector<1x1x32xf32>
    %87 = vector.shape_cast %86 : vector<1x1x32xf32> to vector<1x32xf32>
    %cst_42 = arith.constant dense<0.000000e+00> : vector<1x96xf32>
    %88 = tpu.matmul %87, %4, %cst_42 {dimension_numbers = #tpu.dot_dimension_numbers<[1], [0], [0], [1], [0, 0, 1, 1], [], []>} : vector<1x32xf32>, vector<32x96xf32>, vector<1x96xf32> -> vector<1x96xf32>
    %89 = arith.addf %34, %88 : vector<1x96xf32>
    %cst_43 = arith.constant dense<0.000000e+00> : vector<1x96xf32>
    %90 = tpu.matmul %64, %5, %cst_43 {dimension_numbers = #tpu.dot_dimension_numbers<[1], [0], [0], [1], [0, 0, 1, 1], [], []>} : vector<1x32xf32>, vector<32x96xf32>, vector<1x96xf32> -> vector<1x96xf32>
    %91 = arith.addf %90, %6 : vector<1x96xf32>
    %92 = vector.extract_strided_slice %89 {offsets = [0, 0], sizes = [1, 32], strides = [1, 1]} : vector<1x96xf32> to vector<1x32xf32>
    %93 = vector.extract_strided_slice %91 {offsets = [0, 0], sizes = [1, 32], strides = [1, 1]} : vector<1x96xf32> to vector<1x32xf32>
    %94 = arith.addf %92, %93 : vector<1x32xf32>
    %95 = arith.negf %94 : vector<1x32xf32>
    %96 = math.exp %95 : vector<1x32xf32>
    %cst_44 = arith.constant 1.000000e+00 : f32
    %97 = vector.broadcast %cst_44 : f32 to vector<1x32xf32>
    %98 = arith.addf %97, %96 : vector<1x32xf32>
    %99 = arith.divf %97, %98 : vector<1x32xf32>
    %100 = vector.extract_strided_slice %89 {offsets = [0, 32], sizes = [1, 32], strides = [1, 1]} : vector<1x96xf32> to vector<1x32xf32>
    %101 = vector.extract_strided_slice %91 {offsets = [0, 32], sizes = [1, 32], strides = [1, 1]} : vector<1x96xf32> to vector<1x32xf32>
    %102 = arith.addf %100, %101 : vector<1x32xf32>
    %103 = arith.negf %102 : vector<1x32xf32>
    %104 = math.exp %103 : vector<1x32xf32>
    %cst_45 = arith.constant 1.000000e+00 : f32
    %105 = vector.broadcast %cst_45 : f32 to vector<1x32xf32>
    %106 = arith.addf %105, %104 : vector<1x32xf32>
    %107 = arith.divf %105, %106 : vector<1x32xf32>
    %108 = vector.extract_strided_slice %89 {offsets = [0, 64], sizes = [1, 32], strides = [1, 1]} : vector<1x96xf32> to vector<1x32xf32>
    %109 = vector.extract_strided_slice %91 {offsets = [0, 64], sizes = [1, 32], strides = [1, 1]} : vector<1x96xf32> to vector<1x32xf32>
    %110 = arith.mulf %99, %109 : vector<1x32xf32>
    %111 = arith.addf %108, %110 : vector<1x32xf32>
    %112 = math.tanh %111 : vector<1x32xf32>
    %cst_46 = arith.constant 1.000000e+00 : f32
    %113 = vector.broadcast %cst_46 : f32 to vector<1x32xf32>
    %114 = arith.subf %113, %107 : vector<1x32xf32>
    %115 = arith.mulf %114, %112 : vector<1x32xf32>
    %116 = arith.mulf %107, %64 : vector<1x32xf32>
    %117 = arith.addf %115, %116 : vector<1x32xf32>
    %cst_47 = arith.constant 0.000000e+00 : f32
    %118 = vector.broadcast %cst_47 : f32 to vector<1x32xf32>
    %119 = arith.maximumf %117, %118 : vector<1x32xf32>
    %cst_48 = arith.constant dense<0.000000e+00> : vector<1x12xf32>
    %120 = tpu.matmul %119, %7, %cst_48 {dimension_numbers = #tpu.dot_dimension_numbers<[1], [0], [0], [1], [0, 0, 1, 1], [], []>} : vector<1x32xf32>, vector<32x12xf32>, vector<1x12xf32> -> vector<1x12xf32>
    %121 = arith.addf %120, %8 : vector<1x12xf32>
    %cst_49 = arith.constant dense<0xFF800000> : vector<1xf32>
    %122 = vector.multi_reduction <maximumf>, %121, %cst_49 [1] : vector<1x12xf32> to vector<1xf32>
    %123 = vector.shape_cast %122 : vector<1xf32> to vector<1x1xf32>
    %124 = vector.broadcast %123 : vector<1x1xf32> to vector<1x12xf32>
    %125 = arith.subf %121, %124 : vector<1x12xf32>
    %126 = math.exp %125 : vector<1x12xf32>
    %cst_50 = arith.constant dense<0.000000e+00> : vector<1xf32>
    %127 = vector.multi_reduction <add>, %126, %cst_50 [1] : vector<1x12xf32> to vector<1xf32>
    %128 = vector.shape_cast %127 : vector<1xf32> to vector<1x1xf32>
    %129 = vector.broadcast %128 : vector<1x1xf32> to vector<1x12xf32>
    %130 = arith.divf %126, %129 : vector<1x12xf32>
    %c1 = arith.constant 1 : index
    %c0_51 = arith.constant 0 : index
    %131 = vector.load %arg12[%c1, %c0_51] : memref<8x12xf32, #tpu.memory_space<vmem>>, vector<1x12xf32>
    tpu.vector_store %arg12[%c1, %c0_51], %130 {strides = array<i32>} : memref<8x12xf32, #tpu.memory_space<vmem>>, vector<1x12xf32>,
    %132 = vector.broadcast %123 : vector<1x1xf32> to vector<1x12xf32>
    %133 = arith.cmpf oeq, %121, %132 : vector<1x12xf32>
    %c12_i32_52 = arith.constant 12 : i32
    %134 = vector.broadcast %c12_i32_52 : i32 to vector<1x12xi32>
    %135 = arith.select %133, %9, %134 : vector<1x12xi1>, vector<1x12xi32>
    %cst_53 = arith.constant dense<2147483647> : vector<1xi32>
    %136 = vector.multi_reduction <minsi>, %135, %cst_53 [1] : vector<1x12xi32> to vector<1xi32>
    %137 = vector.extract %136[0] : i32 from vector<1xi32>
    %138 = arith.index_cast %137 : i32 to index
    %c0_54 = arith.constant 0 : index
    %c0_55 = arith.constant 0 : index
    %139 = vector.load %arg1[%138, %c0_54, %c0_55] : memref<12x1x32xf32, #tpu.memory_space<vmem>>, vector<1x1x32xf32>
    %140 = vector.shape_cast %139 : vector<1x1x32xf32> to vector<1x32xf32>
    %cst_56 = arith.constant dense<0.000000e+00> : vector<1x96xf32>
    %141 = tpu.matmul %140, %4, %cst_56 {dimension_numbers = #tpu.dot_dimension_numbers<[1], [0], [0], [1], [0, 0, 1, 1], [], []>} : vector<1x32xf32>, vector<32x96xf32>, vector<1x96xf32> -> vector<1x96xf32>
    %142 = arith.addf %34, %141 : vector<1x96xf32>
    %cst_57 = arith.constant dense<0.000000e+00> : vector<1x96xf32>
    %143 = tpu.matmul %117, %5, %cst_57 {dimension_numbers = #tpu.dot_dimension_numbers<[1], [0], [0], [1], [0, 0, 1, 1], [], []>} : vector<1x32xf32>, vector<32x96xf32>, vector<1x96xf32> -> vector<1x96xf32>
    %144 = arith.addf %143, %6 : vector<1x96xf32>
    %145 = vector.extract_strided_slice %142 {offsets = [0, 0], sizes = [1, 32], strides = [1, 1]} : vector<1x96xf32> to vector<1x32xf32>
    %146 = vector.extract_strided_slice %144 {offsets = [0, 0], sizes = [1, 32], strides = [1, 1]} : vector<1x96xf32> to vector<1x32xf32>
    %147 = arith.addf %145, %146 : vector<1x32xf32>
    %148 = arith.negf %147 : vector<1x32xf32>
    %149 = math.exp %148 : vector<1x32xf32>
    %cst_58 = arith.constant 1.000000e+00 : f32
    %150 = vector.broadcast %cst_58 : f32 to vector<1x32xf32>
    %151 = arith.addf %150, %149 : vector<1x32xf32>
    %152 = arith.divf %150, %151 : vector<1x32xf32>
    %153 = vector.extract_strided_slice %142 {offsets = [0, 32], sizes = [1, 32], strides = [1, 1]} : vector<1x96xf32> to vector<1x32xf32>
    %154 = vector.extract_strided_slice %144 {offsets = [0, 32], sizes = [1, 32], strides = [1, 1]} : vector<1x96xf32> to vector<1x32xf32>
    %155 = arith.addf %153, %154 : vector<1x32xf32>
    %156 = arith.negf %155 : vector<1x32xf32>
    %157 = math.exp %156 : vector<1x32xf32>
    %cst_59 = arith.constant 1.000000e+00 : f32
    %158 = vector.broadcast %cst_59 : f32 to vector<1x32xf32>
    %159 = arith.addf %158, %157 : vector<1x32xf32>
    %160 = arith.divf %158, %159 : vector<1x32xf32>
    %161 = vector.extract_strided_slice %142 {offsets = [0, 64], sizes = [1, 32], strides = [1, 1]} : vector<1x96xf32> to vector<1x32xf32>
    %162 = vector.extract_strided_slice %144 {offsets = [0, 64], sizes = [1, 32], strides = [1, 1]} : vector<1x96xf32> to vector<1x32xf32>
    %163 = arith.mulf %152, %162 : vector<1x32xf32>
    %164 = arith.addf %161, %163 : vector<1x32xf32>
    %165 = math.tanh %164 : vector<1x32xf32>
    %cst_60 = arith.constant 1.000000e+00 : f32
    %166 = vector.broadcast %cst_60 : f32 to vector<1x32xf32>
    %167 = arith.subf %166, %160 : vector<1x32xf32>
    %168 = arith.mulf %167, %165 : vector<1x32xf32>
    %169 = arith.mulf %160, %117 : vector<1x32xf32>
    %170 = arith.addf %168, %169 : vector<1x32xf32>
    %cst_61 = arith.constant 0.000000e+00 : f32
    %171 = vector.broadcast %cst_61 : f32 to vector<1x32xf32>
    %172 = arith.maximumf %170, %171 : vector<1x32xf32>
    %cst_62 = arith.constant dense<0.000000e+00> : vector<1x12xf32>
    %173 = tpu.matmul %172, %7, %cst_62 {dimension_numbers = #tpu.dot_dimension_numbers<[1], [0], [0], [1], [0, 0, 1, 1], [], []>} : vector<1x32xf32>, vector<32x12xf32>, vector<1x12xf32> -> vector<1x12xf32>
    %174 = arith.addf %173, %8 : vector<1x12xf32>
    %cst_63 = arith.constant dense<0xFF800000> : vector<1xf32>
    %175 = vector.multi_reduction <maximumf>, %174, %cst_63 [1] : vector<1x12xf32> to vector<1xf32>
    %176 = vector.shape_cast %175 : vector<1xf32> to vector<1x1xf32>
    %177 = vector.broadcast %176 : vector<1x1xf32> to vector<1x12xf32>
    %178 = arith.subf %174, %177 : vector<1x12xf32>
    %179 = math.exp %178 : vector<1x12xf32>
    %cst_64 = arith.constant dense<0.000000e+00> : vector<1xf32>
    %180 = vector.multi_reduction <add>, %179, %cst_64 [1] : vector<1x12xf32> to vector<1xf32>
    %181 = vector.shape_cast %180 : vector<1xf32> to vector<1x1xf32>
    %182 = vector.broadcast %181 : vector<1x1xf32> to vector<1x12xf32>
    %183 = arith.divf %179, %182 : vector<1x12xf32>
    %c2 = arith.constant 2 : index
    %c0_65 = arith.constant 0 : index
    %184 = vector.load %arg12[%c2, %c0_65] : memref<8x12xf32, #tpu.memory_space<vmem>>, vector<1x12xf32>
    tpu.vector_store %arg12[%c2, %c0_65], %183 {strides = array<i32>} : memref<8x12xf32, #tpu.memory_space<vmem>>, vector<1x12xf32>,
    %185 = vector.broadcast %176 : vector<1x1xf32> to vector<1x12xf32>
    %186 = arith.cmpf oeq, %174, %185 : vector<1x12xf32>
    %c12_i32_66 = arith.constant 12 : i32
    %187 = vector.broadcast %c12_i32_66 : i32 to vector<1x12xi32>
    %188 = arith.select %186, %9, %187 : vector<1x12xi1>, vector<1x12xi32>
    %cst_67 = arith.constant dense<2147483647> : vector<1xi32>
    %189 = vector.multi_reduction <minsi>, %188, %cst_67 [1] : vector<1x12xi32> to vector<1xi32>
    %190 = vector.extract %189[0] : i32 from vector<1xi32>
    %191 = arith.index_cast %190 : i32 to index
    %c0_68 = arith.constant 0 : index
    %c0_69 = arith.constant 0 : index
    %192 = vector.load %arg1[%191, %c0_68, %c0_69] : memref<12x1x32xf32, #tpu.memory_space<vmem>>, vector<1x1x32xf32>
    %193 = vector.shape_cast %192 : vector<1x1x32xf32> to vector<1x32xf32>
    %cst_70 = arith.constant dense<0.000000e+00> : vector<1x96xf32>
    %194 = tpu.matmul %193, %4, %cst_70 {dimension_numbers = #tpu.dot_dimension_numbers<[1], [0], [0], [1], [0, 0, 1, 1], [], []>} : vector<1x32xf32>, vector<32x96xf32>, vector<1x96xf32> -> vector<1x96xf32>
    %195 = arith.addf %34, %194 : vector<1x96xf32>
    %cst_71 = arith.constant dense<0.000000e+00> : vector<1x96xf32>
    %196 = tpu.matmul %170, %5, %cst_71 {dimension_numbers = #tpu.dot_dimension_numbers<[1], [0], [0], [1], [0, 0, 1, 1], [], []>} : vector<1x32xf32>, vector<32x96xf32>, vector<1x96xf32> -> vector<1x96xf32>
    %197 = arith.addf %196, %6 : vector<1x96xf32>
    %198 = vector.extract_strided_slice %195 {offsets = [0, 0], sizes = [1, 32], strides = [1, 1]} : vector<1x96xf32> to vector<1x32xf32>
    %199 = vector.extract_strided_slice %197 {offsets = [0, 0], sizes = [1, 32], strides = [1, 1]} : vector<1x96xf32> to vector<1x32xf32>
    %200 = arith.addf %198, %199 : vector<1x32xf32>
    %201 = arith.negf %200 : vector<1x32xf32>
    %202 = math.exp %201 : vector<1x32xf32>
    %cst_72 = arith.constant 1.000000e+00 : f32
    %203 = vector.broadcast %cst_72 : f32 to vector<1x32xf32>
    %204 = arith.addf %203, %202 : vector<1x32xf32>
    %205 = arith.divf %203, %204 : vector<1x32xf32>
    %206 = vector.extract_strided_slice %195 {offsets = [0, 32], sizes = [1, 32], strides = [1, 1]} : vector<1x96xf32> to vector<1x32xf32>
    %207 = vector.extract_strided_slice %197 {offsets = [0, 32], sizes = [1, 32], strides = [1, 1]} : vector<1x96xf32> to vector<1x32xf32>
    %208 = arith.addf %206, %207 : vector<1x32xf32>
    %209 = arith.negf %208 : vector<1x32xf32>
    %210 = math.exp %209 : vector<1x32xf32>
    %cst_73 = arith.constant 1.000000e+00 : f32
    %211 = vector.broadcast %cst_73 : f32 to vector<1x32xf32>
    %212 = arith.addf %211, %210 : vector<1x32xf32>
    %213 = arith.divf %211, %212 : vector<1x32xf32>
    %214 = vector.extract_strided_slice %195 {offsets = [0, 64], sizes = [1, 32], strides = [1, 1]} : vector<1x96xf32> to vector<1x32xf32>
    %215 = vector.extract_strided_slice %197 {offsets = [0, 64], sizes = [1, 32], strides = [1, 1]} : vector<1x96xf32> to vector<1x32xf32>
    %216 = arith.mulf %205, %215 : vector<1x32xf32>
    %217 = arith.addf %214, %216 : vector<1x32xf32>
    %218 = math.tanh %217 : vector<1x32xf32>
    %cst_74 = arith.constant 1.000000e+00 : f32
    %219 = vector.broadcast %cst_74 : f32 to vector<1x32xf32>
    %220 = arith.subf %219, %213 : vector<1x32xf32>
    %221 = arith.mulf %220, %218 : vector<1x32xf32>
    %222 = arith.mulf %213, %170 : vector<1x32xf32>
    %223 = arith.addf %221, %222 : vector<1x32xf32>
    %cst_75 = arith.constant 0.000000e+00 : f32
    %224 = vector.broadcast %cst_75 : f32 to vector<1x32xf32>
    %225 = arith.maximumf %223, %224 : vector<1x32xf32>
    %cst_76 = arith.constant dense<0.000000e+00> : vector<1x12xf32>
    %226 = tpu.matmul %225, %7, %cst_76 {dimension_numbers = #tpu.dot_dimension_numbers<[1], [0], [0], [1], [0, 0, 1, 1], [], []>} : vector<1x32xf32>, vector<32x12xf32>, vector<1x12xf32> -> vector<1x12xf32>
    %227 = arith.addf %226, %8 : vector<1x12xf32>
    %cst_77 = arith.constant dense<0xFF800000> : vector<1xf32>
    %228 = vector.multi_reduction <maximumf>, %227, %cst_77 [1] : vector<1x12xf32> to vector<1xf32>
    %229 = vector.shape_cast %228 : vector<1xf32> to vector<1x1xf32>
    %230 = vector.broadcast %229 : vector<1x1xf32> to vector<1x12xf32>
    %231 = arith.subf %227, %230 : vector<1x12xf32>
    %232 = math.exp %231 : vector<1x12xf32>
    %cst_78 = arith.constant dense<0.000000e+00> : vector<1xf32>
    %233 = vector.multi_reduction <add>, %232, %cst_78 [1] : vector<1x12xf32> to vector<1xf32>
    %234 = vector.shape_cast %233 : vector<1xf32> to vector<1x1xf32>
    %235 = vector.broadcast %234 : vector<1x1xf32> to vector<1x12xf32>
    %236 = arith.divf %232, %235 : vector<1x12xf32>
    %c3 = arith.constant 3 : index
    %c0_79 = arith.constant 0 : index
    %237 = vector.load %arg12[%c3, %c0_79] : memref<8x12xf32, #tpu.memory_space<vmem>>, vector<1x12xf32>
    tpu.vector_store %arg12[%c3, %c0_79], %236 {strides = array<i32>} : memref<8x12xf32, #tpu.memory_space<vmem>>, vector<1x12xf32>,
    %238 = vector.broadcast %229 : vector<1x1xf32> to vector<1x12xf32>
    %239 = arith.cmpf oeq, %227, %238 : vector<1x12xf32>
    %c12_i32_80 = arith.constant 12 : i32
    %240 = vector.broadcast %c12_i32_80 : i32 to vector<1x12xi32>
    %241 = arith.select %239, %9, %240 : vector<1x12xi1>, vector<1x12xi32>
    %cst_81 = arith.constant dense<2147483647> : vector<1xi32>
    %242 = vector.multi_reduction <minsi>, %241, %cst_81 [1] : vector<1x12xi32> to vector<1xi32>
    %243 = vector.extract %242[0] : i32 from vector<1xi32>
    %244 = arith.index_cast %243 : i32 to index
    %c0_82 = arith.constant 0 : index
    %c0_83 = arith.constant 0 : index
    %245 = vector.load %arg1[%244, %c0_82, %c0_83] : memref<12x1x32xf32, #tpu.memory_space<vmem>>, vector<1x1x32xf32>
    %246 = vector.shape_cast %245 : vector<1x1x32xf32> to vector<1x32xf32>
    %cst_84 = arith.constant dense<0.000000e+00> : vector<1x96xf32>
    %247 = tpu.matmul %246, %4, %cst_84 {dimension_numbers = #tpu.dot_dimension_numbers<[1], [0], [0], [1], [0, 0, 1, 1], [], []>} : vector<1x32xf32>, vector<32x96xf32>, vector<1x96xf32> -> vector<1x96xf32>
    %248 = arith.addf %34, %247 : vector<1x96xf32>
    %cst_85 = arith.constant dense<0.000000e+00> : vector<1x96xf32>
    %249 = tpu.matmul %223, %5, %cst_85 {dimension_numbers = #tpu.dot_dimension_numbers<[1], [0], [0], [1], [0, 0, 1, 1], [], []>} : vector<1x32xf32>, vector<32x96xf32>, vector<1x96xf32> -> vector<1x96xf32>
    %250 = arith.addf %249, %6 : vector<1x96xf32>
    %251 = vector.extract_strided_slice %248 {offsets = [0, 0], sizes = [1, 32], strides = [1, 1]} : vector<1x96xf32> to vector<1x32xf32>
    %252 = vector.extract_strided_slice %250 {offsets = [0, 0], sizes = [1, 32], strides = [1, 1]} : vector<1x96xf32> to vector<1x32xf32>
    %253 = arith.addf %251, %252 : vector<1x32xf32>
    %254 = arith.negf %253 : vector<1x32xf32>
    %255 = math.exp %254 : vector<1x32xf32>
    %cst_86 = arith.constant 1.000000e+00 : f32
    %256 = vector.broadcast %cst_86 : f32 to vector<1x32xf32>
    %257 = arith.addf %256, %255 : vector<1x32xf32>
    %258 = arith.divf %256, %257 : vector<1x32xf32>
    %259 = vector.extract_strided_slice %248 {offsets = [0, 32], sizes = [1, 32], strides = [1, 1]} : vector<1x96xf32> to vector<1x32xf32>
    %260 = vector.extract_strided_slice %250 {offsets = [0, 32], sizes = [1, 32], strides = [1, 1]} : vector<1x96xf32> to vector<1x32xf32>
    %261 = arith.addf %259, %260 : vector<1x32xf32>
    %262 = arith.negf %261 : vector<1x32xf32>
    %263 = math.exp %262 : vector<1x32xf32>
    %cst_87 = arith.constant 1.000000e+00 : f32
    %264 = vector.broadcast %cst_87 : f32 to vector<1x32xf32>
    %265 = arith.addf %264, %263 : vector<1x32xf32>
    %266 = arith.divf %264, %265 : vector<1x32xf32>
    %267 = vector.extract_strided_slice %248 {offsets = [0, 64], sizes = [1, 32], strides = [1, 1]} : vector<1x96xf32> to vector<1x32xf32>
    %268 = vector.extract_strided_slice %250 {offsets = [0, 64], sizes = [1, 32], strides = [1, 1]} : vector<1x96xf32> to vector<1x32xf32>
    %269 = arith.mulf %258, %268 : vector<1x32xf32>
    %270 = arith.addf %267, %269 : vector<1x32xf32>
    %271 = math.tanh %270 : vector<1x32xf32>
    %cst_88 = arith.constant 1.000000e+00 : f32
    %272 = vector.broadcast %cst_88 : f32 to vector<1x32xf32>
    %273 = arith.subf %272, %266 : vector<1x32xf32>
    %274 = arith.mulf %273, %271 : vector<1x32xf32>
    %275 = arith.mulf %266, %223 : vector<1x32xf32>
    %276 = arith.addf %274, %275 : vector<1x32xf32>
    %cst_89 = arith.constant 0.000000e+00 : f32
    %277 = vector.broadcast %cst_89 : f32 to vector<1x32xf32>
    %278 = arith.maximumf %276, %277 : vector<1x32xf32>
    %cst_90 = arith.constant dense<0.000000e+00> : vector<1x12xf32>
    %279 = tpu.matmul %278, %7, %cst_90 {dimension_numbers = #tpu.dot_dimension_numbers<[1], [0], [0], [1], [0, 0, 1, 1], [], []>} : vector<1x32xf32>, vector<32x12xf32>, vector<1x12xf32> -> vector<1x12xf32>
    %280 = arith.addf %279, %8 : vector<1x12xf32>
    %cst_91 = arith.constant dense<0xFF800000> : vector<1xf32>
    %281 = vector.multi_reduction <maximumf>, %280, %cst_91 [1] : vector<1x12xf32> to vector<1xf32>
    %282 = vector.shape_cast %281 : vector<1xf32> to vector<1x1xf32>
    %283 = vector.broadcast %282 : vector<1x1xf32> to vector<1x12xf32>
    %284 = arith.subf %280, %283 : vector<1x12xf32>
    %285 = math.exp %284 : vector<1x12xf32>
    %cst_92 = arith.constant dense<0.000000e+00> : vector<1xf32>
    %286 = vector.multi_reduction <add>, %285, %cst_92 [1] : vector<1x12xf32> to vector<1xf32>
    %287 = vector.shape_cast %286 : vector<1xf32> to vector<1x1xf32>
    %288 = vector.broadcast %287 : vector<1x1xf32> to vector<1x12xf32>
    %289 = arith.divf %285, %288 : vector<1x12xf32>
    %c4 = arith.constant 4 : index
    %c0_93 = arith.constant 0 : index
    %290 = vector.load %arg12[%c4, %c0_93] : memref<8x12xf32, #tpu.memory_space<vmem>>, vector<1x12xf32>
    tpu.vector_store %arg12[%c4, %c0_93], %289 {strides = array<i32>} : memref<8x12xf32, #tpu.memory_space<vmem>>, vector<1x12xf32>,
    %291 = vector.broadcast %282 : vector<1x1xf32> to vector<1x12xf32>
    %292 = arith.cmpf oeq, %280, %291 : vector<1x12xf32>
    %c12_i32_94 = arith.constant 12 : i32
    %293 = vector.broadcast %c12_i32_94 : i32 to vector<1x12xi32>
    %294 = arith.select %292, %9, %293 : vector<1x12xi1>, vector<1x12xi32>
    %cst_95 = arith.constant dense<2147483647> : vector<1xi32>
    %295 = vector.multi_reduction <minsi>, %294, %cst_95 [1] : vector<1x12xi32> to vector<1xi32>
    %296 = vector.extract %295[0] : i32 from vector<1xi32>
    %297 = arith.index_cast %296 : i32 to index
    %c0_96 = arith.constant 0 : index
    %c0_97 = arith.constant 0 : index
    %298 = vector.load %arg1[%297, %c0_96, %c0_97] : memref<12x1x32xf32, #tpu.memory_space<vmem>>, vector<1x1x32xf32>
    %299 = vector.shape_cast %298 : vector<1x1x32xf32> to vector<1x32xf32>
    %cst_98 = arith.constant dense<0.000000e+00> : vector<1x96xf32>
    %300 = tpu.matmul %299, %4, %cst_98 {dimension_numbers = #tpu.dot_dimension_numbers<[1], [0], [0], [1], [0, 0, 1, 1], [], []>} : vector<1x32xf32>, vector<32x96xf32>, vector<1x96xf32> -> vector<1x96xf32>
    %301 = arith.addf %34, %300 : vector<1x96xf32>
    %cst_99 = arith.constant dense<0.000000e+00> : vector<1x96xf32>
    %302 = tpu.matmul %276, %5, %cst_99 {dimension_numbers = #tpu.dot_dimension_numbers<[1], [0], [0], [1], [0, 0, 1, 1], [], []>} : vector<1x32xf32>, vector<32x96xf32>, vector<1x96xf32> -> vector<1x96xf32>
    %303 = arith.addf %302, %6 : vector<1x96xf32>
    %304 = vector.extract_strided_slice %301 {offsets = [0, 0], sizes = [1, 32], strides = [1, 1]} : vector<1x96xf32> to vector<1x32xf32>
    %305 = vector.extract_strided_slice %303 {offsets = [0, 0], sizes = [1, 32], strides = [1, 1]} : vector<1x96xf32> to vector<1x32xf32>
    %306 = arith.addf %304, %305 : vector<1x32xf32>
    %307 = arith.negf %306 : vector<1x32xf32>
    %308 = math.exp %307 : vector<1x32xf32>
    %cst_100 = arith.constant 1.000000e+00 : f32
    %309 = vector.broadcast %cst_100 : f32 to vector<1x32xf32>
    %310 = arith.addf %309, %308 : vector<1x32xf32>
    %311 = arith.divf %309, %310 : vector<1x32xf32>
    %312 = vector.extract_strided_slice %301 {offsets = [0, 32], sizes = [1, 32], strides = [1, 1]} : vector<1x96xf32> to vector<1x32xf32>
    %313 = vector.extract_strided_slice %303 {offsets = [0, 32], sizes = [1, 32], strides = [1, 1]} : vector<1x96xf32> to vector<1x32xf32>
    %314 = arith.addf %312, %313 : vector<1x32xf32>
    %315 = arith.negf %314 : vector<1x32xf32>
    %316 = math.exp %315 : vector<1x32xf32>
    %cst_101 = arith.constant 1.000000e+00 : f32
    %317 = vector.broadcast %cst_101 : f32 to vector<1x32xf32>
    %318 = arith.addf %317, %316 : vector<1x32xf32>
    %319 = arith.divf %317, %318 : vector<1x32xf32>
    %320 = vector.extract_strided_slice %301 {offsets = [0, 64], sizes = [1, 32], strides = [1, 1]} : vector<1x96xf32> to vector<1x32xf32>
    %321 = vector.extract_strided_slice %303 {offsets = [0, 64], sizes = [1, 32], strides = [1, 1]} : vector<1x96xf32> to vector<1x32xf32>
    %322 = arith.mulf %311, %321 : vector<1x32xf32>
    %323 = arith.addf %320, %322 : vector<1x32xf32>
    %324 = math.tanh %323 : vector<1x32xf32>
    %cst_102 = arith.constant 1.000000e+00 : f32
    %325 = vector.broadcast %cst_102 : f32 to vector<1x32xf32>
    %326 = arith.subf %325, %319 : vector<1x32xf32>
    %327 = arith.mulf %326, %324 : vector<1x32xf32>
    %328 = arith.mulf %319, %276 : vector<1x32xf32>
    %329 = arith.addf %327, %328 : vector<1x32xf32>
    %cst_103 = arith.constant 0.000000e+00 : f32
    %330 = vector.broadcast %cst_103 : f32 to vector<1x32xf32>
    %331 = arith.maximumf %329, %330 : vector<1x32xf32>
    %cst_104 = arith.constant dense<0.000000e+00> : vector<1x12xf32>
    %332 = tpu.matmul %331, %7, %cst_104 {dimension_numbers = #tpu.dot_dimension_numbers<[1], [0], [0], [1], [0, 0, 1, 1], [], []>} : vector<1x32xf32>, vector<32x12xf32>, vector<1x12xf32> -> vector<1x12xf32>
    %333 = arith.addf %332, %8 : vector<1x12xf32>
    %cst_105 = arith.constant dense<0xFF800000> : vector<1xf32>
    %334 = vector.multi_reduction <maximumf>, %333, %cst_105 [1] : vector<1x12xf32> to vector<1xf32>
    %335 = vector.shape_cast %334 : vector<1xf32> to vector<1x1xf32>
    %336 = vector.broadcast %335 : vector<1x1xf32> to vector<1x12xf32>
    %337 = arith.subf %333, %336 : vector<1x12xf32>
    %338 = math.exp %337 : vector<1x12xf32>
    %cst_106 = arith.constant dense<0.000000e+00> : vector<1xf32>
    %339 = vector.multi_reduction <add>, %338, %cst_106 [1] : vector<1x12xf32> to vector<1xf32>
    %340 = vector.shape_cast %339 : vector<1xf32> to vector<1x1xf32>
    %341 = vector.broadcast %340 : vector<1x1xf32> to vector<1x12xf32>
    %342 = arith.divf %338, %341 : vector<1x12xf32>
    %c5 = arith.constant 5 : index
    %c0_107 = arith.constant 0 : index
    %343 = vector.load %arg12[%c5, %c0_107] : memref<8x12xf32, #tpu.memory_space<vmem>>, vector<1x12xf32>
    tpu.vector_store %arg12[%c5, %c0_107], %342 {strides = array<i32>} : memref<8x12xf32, #tpu.memory_space<vmem>>, vector<1x12xf32>,
    %344 = vector.broadcast %335 : vector<1x1xf32> to vector<1x12xf32>
    %345 = arith.cmpf oeq, %333, %344 : vector<1x12xf32>
    %c12_i32_108 = arith.constant 12 : i32
    %346 = vector.broadcast %c12_i32_108 : i32 to vector<1x12xi32>
    %347 = arith.select %345, %9, %346 : vector<1x12xi1>, vector<1x12xi32>
    %cst_109 = arith.constant dense<2147483647> : vector<1xi32>
    %348 = vector.multi_reduction <minsi>, %347, %cst_109 [1] : vector<1x12xi32> to vector<1xi32>
    %349 = vector.extract %348[0] : i32 from vector<1xi32>
    %350 = arith.index_cast %349 : i32 to index
    %c0_110 = arith.constant 0 : index
    %c0_111 = arith.constant 0 : index
    %351 = vector.load %arg1[%350, %c0_110, %c0_111] : memref<12x1x32xf32, #tpu.memory_space<vmem>>, vector<1x1x32xf32>
    %352 = vector.shape_cast %351 : vector<1x1x32xf32> to vector<1x32xf32>
    %cst_112 = arith.constant dense<0.000000e+00> : vector<1x96xf32>
    %353 = tpu.matmul %352, %4, %cst_112 {dimension_numbers = #tpu.dot_dimension_numbers<[1], [0], [0], [1], [0, 0, 1, 1], [], []>} : vector<1x32xf32>, vector<32x96xf32>, vector<1x96xf32> -> vector<1x96xf32>
    %354 = arith.addf %34, %353 : vector<1x96xf32>
    %cst_113 = arith.constant dense<0.000000e+00> : vector<1x96xf32>
    %355 = tpu.matmul %329, %5, %cst_113 {dimension_numbers = #tpu.dot_dimension_numbers<[1], [0], [0], [1], [0, 0, 1, 1], [], []>} : vector<1x32xf32>, vector<32x96xf32>, vector<1x96xf32> -> vector<1x96xf32>
    %356 = arith.addf %355, %6 : vector<1x96xf32>
    %357 = vector.extract_strided_slice %354 {offsets = [0, 0], sizes = [1, 32], strides = [1, 1]} : vector<1x96xf32> to vector<1x32xf32>
    %358 = vector.extract_strided_slice %356 {offsets = [0, 0], sizes = [1, 32], strides = [1, 1]} : vector<1x96xf32> to vector<1x32xf32>
    %359 = arith.addf %357, %358 : vector<1x32xf32>
    %360 = arith.negf %359 : vector<1x32xf32>
    %361 = math.exp %360 : vector<1x32xf32>
    %cst_114 = arith.constant 1.000000e+00 : f32
    %362 = vector.broadcast %cst_114 : f32 to vector<1x32xf32>
    %363 = arith.addf %362, %361 : vector<1x32xf32>
    %364 = arith.divf %362, %363 : vector<1x32xf32>
    %365 = vector.extract_strided_slice %354 {offsets = [0, 32], sizes = [1, 32], strides = [1, 1]} : vector<1x96xf32> to vector<1x32xf32>
    %366 = vector.extract_strided_slice %356 {offsets = [0, 32], sizes = [1, 32], strides = [1, 1]} : vector<1x96xf32> to vector<1x32xf32>
    %367 = arith.addf %365, %366 : vector<1x32xf32>
    %368 = arith.negf %367 : vector<1x32xf32>
    %369 = math.exp %368 : vector<1x32xf32>
    %cst_115 = arith.constant 1.000000e+00 : f32
    %370 = vector.broadcast %cst_115 : f32 to vector<1x32xf32>
    %371 = arith.addf %370, %369 : vector<1x32xf32>
    %372 = arith.divf %370, %371 : vector<1x32xf32>
    %373 = vector.extract_strided_slice %354 {offsets = [0, 64], sizes = [1, 32], strides = [1, 1]} : vector<1x96xf32> to vector<1x32xf32>
    %374 = vector.extract_strided_slice %356 {offsets = [0, 64], sizes = [1, 32], strides = [1, 1]} : vector<1x96xf32> to vector<1x32xf32>
    %375 = arith.mulf %364, %374 : vector<1x32xf32>
    %376 = arith.addf %373, %375 : vector<1x32xf32>
    %377 = math.tanh %376 : vector<1x32xf32>
    %cst_116 = arith.constant 1.000000e+00 : f32
    %378 = vector.broadcast %cst_116 : f32 to vector<1x32xf32>
    %379 = arith.subf %378, %372 : vector<1x32xf32>
    %380 = arith.mulf %379, %377 : vector<1x32xf32>
    %381 = arith.mulf %372, %329 : vector<1x32xf32>
    %382 = arith.addf %380, %381 : vector<1x32xf32>
    %cst_117 = arith.constant 0.000000e+00 : f32
    %383 = vector.broadcast %cst_117 : f32 to vector<1x32xf32>
    %384 = arith.maximumf %382, %383 : vector<1x32xf32>
    %cst_118 = arith.constant dense<0.000000e+00> : vector<1x12xf32>
    %385 = tpu.matmul %384, %7, %cst_118 {dimension_numbers = #tpu.dot_dimension_numbers<[1], [0], [0], [1], [0, 0, 1, 1], [], []>} : vector<1x32xf32>, vector<32x12xf32>, vector<1x12xf32> -> vector<1x12xf32>
    %386 = arith.addf %385, %8 : vector<1x12xf32>
    %cst_119 = arith.constant dense<0xFF800000> : vector<1xf32>
    %387 = vector.multi_reduction <maximumf>, %386, %cst_119 [1] : vector<1x12xf32> to vector<1xf32>
    %388 = vector.shape_cast %387 : vector<1xf32> to vector<1x1xf32>
    %389 = vector.broadcast %388 : vector<1x1xf32> to vector<1x12xf32>
    %390 = arith.subf %386, %389 : vector<1x12xf32>
    %391 = math.exp %390 : vector<1x12xf32>
    %cst_120 = arith.constant dense<0.000000e+00> : vector<1xf32>
    %392 = vector.multi_reduction <add>, %391, %cst_120 [1] : vector<1x12xf32> to vector<1xf32>
    %393 = vector.shape_cast %392 : vector<1xf32> to vector<1x1xf32>
    %394 = vector.broadcast %393 : vector<1x1xf32> to vector<1x12xf32>
    %395 = arith.divf %391, %394 : vector<1x12xf32>
    %c6 = arith.constant 6 : index
    %c0_121 = arith.constant 0 : index
    %396 = vector.load %arg12[%c6, %c0_121] : memref<8x12xf32, #tpu.memory_space<vmem>>, vector<1x12xf32>
    tpu.vector_store %arg12[%c6, %c0_121], %395 {strides = array<i32>} : memref<8x12xf32, #tpu.memory_space<vmem>>, vector<1x12xf32>,
    %397 = vector.broadcast %388 : vector<1x1xf32> to vector<1x12xf32>
    %398 = arith.cmpf oeq, %386, %397 : vector<1x12xf32>
    %c12_i32_122 = arith.constant 12 : i32
    %399 = vector.broadcast %c12_i32_122 : i32 to vector<1x12xi32>
    %400 = arith.select %398, %9, %399 : vector<1x12xi1>, vector<1x12xi32>
    %cst_123 = arith.constant dense<2147483647> : vector<1xi32>
    %401 = vector.multi_reduction <minsi>, %400, %cst_123 [1] : vector<1x12xi32> to vector<1xi32>
    %402 = vector.extract %401[0] : i32 from vector<1xi32>
    %403 = arith.index_cast %402 : i32 to index
    %c0_124 = arith.constant 0 : index
    %c0_125 = arith.constant 0 : index
    %404 = vector.load %arg1[%403, %c0_124, %c0_125] : memref<12x1x32xf32, #tpu.memory_space<vmem>>, vector<1x1x32xf32>
    %405 = vector.shape_cast %404 : vector<1x1x32xf32> to vector<1x32xf32>
    %cst_126 = arith.constant dense<0.000000e+00> : vector<1x96xf32>
    %406 = tpu.matmul %405, %4, %cst_126 {dimension_numbers = #tpu.dot_dimension_numbers<[1], [0], [0], [1], [0, 0, 1, 1], [], []>} : vector<1x32xf32>, vector<32x96xf32>, vector<1x96xf32> -> vector<1x96xf32>
    %407 = arith.addf %34, %406 : vector<1x96xf32>
    %cst_127 = arith.constant dense<0.000000e+00> : vector<1x96xf32>
    %408 = tpu.matmul %382, %5, %cst_127 {dimension_numbers = #tpu.dot_dimension_numbers<[1], [0], [0], [1], [0, 0, 1, 1], [], []>} : vector<1x32xf32>, vector<32x96xf32>, vector<1x96xf32> -> vector<1x96xf32>
    %409 = arith.addf %408, %6 : vector<1x96xf32>
    %410 = vector.extract_strided_slice %407 {offsets = [0, 0], sizes = [1, 32], strides = [1, 1]} : vector<1x96xf32> to vector<1x32xf32>
    %411 = vector.extract_strided_slice %409 {offsets = [0, 0], sizes = [1, 32], strides = [1, 1]} : vector<1x96xf32> to vector<1x32xf32>
    %412 = arith.addf %410, %411 : vector<1x32xf32>
    %413 = arith.negf %412 : vector<1x32xf32>
    %414 = math.exp %413 : vector<1x32xf32>
    %cst_128 = arith.constant 1.000000e+00 : f32
    %415 = vector.broadcast %cst_128 : f32 to vector<1x32xf32>
    %416 = arith.addf %415, %414 : vector<1x32xf32>
    %417 = arith.divf %415, %416 : vector<1x32xf32>
    %418 = vector.extract_strided_slice %407 {offsets = [0, 32], sizes = [1, 32], strides = [1, 1]} : vector<1x96xf32> to vector<1x32xf32>
    %419 = vector.extract_strided_slice %409 {offsets = [0, 32], sizes = [1, 32], strides = [1, 1]} : vector<1x96xf32> to vector<1x32xf32>
    %420 = arith.addf %418, %419 : vector<1x32xf32>
    %421 = arith.negf %420 : vector<1x32xf32>
    %422 = math.exp %421 : vector<1x32xf32>
    %cst_129 = arith.constant 1.000000e+00 : f32
    %423 = vector.broadcast %cst_129 : f32 to vector<1x32xf32>
    %424 = arith.addf %423, %422 : vector<1x32xf32>
    %425 = arith.divf %423, %424 : vector<1x32xf32>
    %426 = vector.extract_strided_slice %407 {offsets = [0, 64], sizes = [1, 32], strides = [1, 1]} : vector<1x96xf32> to vector<1x32xf32>
    %427 = vector.extract_strided_slice %409 {offsets = [0, 64], sizes = [1, 32], strides = [1, 1]} : vector<1x96xf32> to vector<1x32xf32>
    %428 = arith.mulf %417, %427 : vector<1x32xf32>
    %429 = arith.addf %426, %428 : vector<1x32xf32>
    %430 = math.tanh %429 : vector<1x32xf32>
    %cst_130 = arith.constant 1.000000e+00 : f32
    %431 = vector.broadcast %cst_130 : f32 to vector<1x32xf32>
    %432 = arith.subf %431, %425 : vector<1x32xf32>
    %433 = arith.mulf %432, %430 : vector<1x32xf32>
    %434 = arith.mulf %425, %382 : vector<1x32xf32>
    %435 = arith.addf %433, %434 : vector<1x32xf32>
    %cst_131 = arith.constant 0.000000e+00 : f32
    %436 = vector.broadcast %cst_131 : f32 to vector<1x32xf32>
    %437 = arith.maximumf %435, %436 : vector<1x32xf32>
    %cst_132 = arith.constant dense<0.000000e+00> : vector<1x12xf32>
    %438 = tpu.matmul %437, %7, %cst_132 {dimension_numbers = #tpu.dot_dimension_numbers<[1], [0], [0], [1], [0, 0, 1, 1], [], []>} : vector<1x32xf32>, vector<32x12xf32>, vector<1x12xf32> -> vector<1x12xf32>
    %439 = arith.addf %438, %8 : vector<1x12xf32>
    %cst_133 = arith.constant dense<0xFF800000> : vector<1xf32>
    %440 = vector.multi_reduction <maximumf>, %439, %cst_133 [1] : vector<1x12xf32> to vector<1xf32>
    %441 = vector.shape_cast %440 : vector<1xf32> to vector<1x1xf32>
    %442 = vector.broadcast %441 : vector<1x1xf32> to vector<1x12xf32>
    %443 = arith.subf %439, %442 : vector<1x12xf32>
    %444 = math.exp %443 : vector<1x12xf32>
    %cst_134 = arith.constant dense<0.000000e+00> : vector<1xf32>
    %445 = vector.multi_reduction <add>, %444, %cst_134 [1] : vector<1x12xf32> to vector<1xf32>
    %446 = vector.shape_cast %445 : vector<1xf32> to vector<1x1xf32>
    %447 = vector.broadcast %446 : vector<1x1xf32> to vector<1x12xf32>
    %448 = arith.divf %444, %447 : vector<1x12xf32>
    %c7 = arith.constant 7 : index
    %c0_135 = arith.constant 0 : index
    %449 = vector.load %arg12[%c7, %c0_135] : memref<8x12xf32, #tpu.memory_space<vmem>>, vector<1x12xf32>
    tpu.vector_store %arg12[%c7, %c0_135], %448 {strides = array<i32>} : memref<8x12xf32, #tpu.memory_space<vmem>>, vector<1x12xf32>,
    return
  }
}

</mosaic_0001>

<bundles_post_ra>
// kernel: leap_forward_pallas.1
= control target key start
LH: loop header
LB: loop body
LE: loop exit
PB: predicated region body
PF: predicated region fallthrough
CT: control target
= control target key end

     0   :  { %s3997_s0 = inlined_call_operand.vmem [shape: f32[6,32], index: 0, kind: input, shape index: {}]   ;;  %s3998_s1 = inlined_call_operand.vmem [shape: f32[12,1,32], index: 1, kind: input, shape index: {}]   ;;  %s3999_s2 = inlined_call_operand.vmem [shape: f32[32,1], index: 2, kind: input, shape index: {}]   ;;  %s4000_s3 = inlined_call_operand.vmem [shape: f32[32,1], index: 3, kind: input, shape index: {}]   ;;  %s4001_s4 = inlined_call_operand.<no memory space> [shape: f32[1,1], index: 4, kind: input, shape index: {}]   ;;  %s4002_s5 = inlined_call_operand.vmem [shape: f32[32,96], index: 5, kind: input, shape index: {}]   ;;  %s4003_s6 = inlined_call_operand.vmem [shape: f32[32,96], index: 6, kind: input, shape index: {}]   ;;  %s4004_s7 = inlined_call_operand.vmem [shape: f32[1,96], index: 7, kind: input, shape index: {}]   ;;  %s4005_s8 = inlined_call_operand.vmem [shape: f32[32,96], index: 8, kind: input, shape index: {}]   ;;  %s4006_s9 = inlined_call_operand.vmem [shape: f32[1,96], index: 9, kind: input, shape index: {}]   ;;  %s4007_s10 = inlined_call_operand.vmem [shape: f32[32,12], index: 10, kind: input, shape index: {}]   ;;  %s4008_s11 = inlined_call_operand.vmem [shape: f32[1,12], index: 11, kind: input, shape index: {}]   ;;  %s4009_s12 = inlined_call_operand.hbm [shape: f32[8,12], index: 12, kind: output, shape index: {}]  }
   0x1   :  { %v17_v0 = vstv %s4001_s4 }
   0x2   :  { %18 = vst [vmem:[#allocation2] sm:$0x1] %v17_v0 }
   0x3   :  { %v48_v1 = vld [vmem:[%s3999_s2 + $0x18] sm:$0xff]  ;;  %v3218_v3 = vmov 0.0   ;;  %v47_v4 = vld [vmem:[%s3999_s2 + $0x10] sm:$0xff]  ;;  %v46_v6 = vld [vmem:[%s3999_s2 + $0x8] sm:$0xff] }
   0x4   :  { %v52_v2 = vld [vmem:[%s4000_s3 + $0x18] sm:$0xff]  ;;  %2779 = vmatprep.subr.mxu0 %v3218_v3  ;;  %2790 = vmatprep.subr.mxu1 %v3218_v3  ;;  %v51_v5 = vld [vmem:[%s4000_s3 + $0x10] sm:$0xff]  ;;  %v50_v7 = vld [vmem:[%s4000_s3 + $0x8] sm:$0xff] }
   0x5   :  { %2780 = vmatpush3.msra.mxu0 %v48_v1  ;;  %2791 = vmatpush3.msra.mxu1 %v52_v2 }
   0x6   :  { %2781 = vmatprep.subr.mxu0 %v3218_v3  ;;  %2792 = vmatprep.subr.mxu1 %v3218_v3 }
   0x7   :  { %19 = vsyncpa [#allocation4], 0  ;;  %2782 = vmatpush3.msra.mxu0 %v47_v4  ;;  %2793 = vmatpush3.msra.mxu1 %v51_v5  ;;  %v45_v8 = vld [vmem:[%s3999_s2] sm:$0xff]  ;;  %v3328_v10 = vld [vmem:[%s3998_s1 + $0xa] sm:$0x1]  ;;  %vm72_vm0 = vcmask 261120   ;;  %v68_v13 = vlaneseq }
   0x8   :  { %2783 = vmatprep.subr.mxu0 %v3218_v3  ;;  %2794 = vmatprep.subr.mxu1 %v3218_v3  ;;  %v49_v9 = vld [vmem:[%s4000_s3] sm:$0xff]  ;;  %vm3219_vm1 = vmmov 0   ;;  %v3220_v12 = vmov 0   ;;  %vm230_vm2 = vcmask 5120   ;;  %v267_v43 = vld [vmem:[%s4002_s5 + $0x18] sm:$0xff]  ;;  %v266_v44 = vld [vmem:[%s4002_s5 + $0x10] sm:$0xff] }
   0x9   :  { %2784 = vmatpush3.msra.mxu0 %v46_v6  ;;  %2795 = vmatpush3.msra.mxu1 %v50_v7  ;;  %v3333_v11 = vld [vmem:[%s3997_s0] sm:$0x3f]  ;;  %v3350_v14 = vshrl.u32 %v68_v13, 7  ;;  %v3365_v45 = vld [vmem:[%s4003_s6 + $0x18] sm:$0xff]  ;;  %v265_v46 = vld [vmem:[%s4002_s5 + $0x8] sm:$0xff]  ;;  %vm256_vm3 = vcmask 259072  }
   0xa   :  { %2785 = vmatprep.subr.mxu0 %v3218_v3  ;;  %2796 = vmatprep.subr.mxu1 %v3218_v3  ;;  %v2610_v19 = vld [vmem:[#allocation2] ss:$0 sm:$0xff]  ;;  %v3376_v47 = vld [vmem:[%s4003_s6 + $0x10] sm:$0xff]  ;;  %v3387_v49 = vld [vmem:[%s4003_s6 + $0x8] sm:$0xff]  ;;  %s3221_s24 = smov 64   ;;  %s3222_s25 = smov 32  }
   0xb   :  { %2786 = vmatpush3.msra.mxu0 %v45_v8  ;;  %2787 = vmatprep.mubr.msk.f32.mxu0 %vm3219_vm1, %v3218_v3  ;;  %v148_v15 = vsub.s32 0, %v3350_v14  ;;  %v264_v48 = vld [vmem:[%s4002_s5] sm:$0xff]  ;;  %v3407_v60 = vld [vmem:[%s4005_s8 + $0x18] sm:$0xff]  ;;  %v3413_v61 = vld [vmem:[%s4005_s8 + $0x10] sm:$0xff]  ;;  %s3223_s16 = smov 96   ;;  %vm592_vm4 = vcmask 90112  }
   0xc   :  { %2797 = vmatpush3.msra.mxu1 %v49_v9  ;;  %2798 = vmatprep.mubr.msk.f32.mxu1 %vm3219_vm1, %v3218_v3  ;;  %v3395_v50 = vld [vmem:[%s4003_s6] sm:$0xff]  ;;  %v3422_v62 = vld [vmem:[%s4005_s8 + $0x8] sm:$0xff] }
   0xd   :  { %2788 = vmatmul.mubr.msk.f32.vlgmr.msra.gmra.mxu0 %vm72_vm0, %v3328_v10  ;;  %2799 = vmatmul.mubr.msk.f32.vlgmr.msra.gmra.mxu1 %vm72_vm0, %v3333_v11  ;;  %v3429_v63 = vld [vmem:[%s4005_s8] sm:$0xff]  ;;  %v510_v9 = vrot.slane %v3328_v10, %v148_v15 }
   0xe   :  { %2801 = vmatprep.subr.mxu0 %v3218_v3  ;;  %2812 = vmatprep.subr.mxu1 %v3218_v3  ;;  %v3450_v5 = vld [vmem:[%s4006_s9] sm:$0x1] }
   0xf   :  { %2809 = vmatprep.mubr.msk.f32.mxu0 %vm3219_vm1, %v3218_v3  ;;  %2820 = vmatprep.mubr.msk.f32.mxu1 %vm3219_vm1, %v3218_v3 }
  0x10   :  { %3097 = vset.pattern.permute.xlu0 %v3220_v12  ;;  %2802 = vmatpush3.msra.mxu0 %v267_v43 }
  0x11   :  { %2803 = vmatprep.subr.mxu0 %v3218_v3  ;;  %2813 = vmatpush3.msra.mxu1 %v3365_v45 }
  0x12   :  { %2804 = vmatpush3.msra.mxu0 %v266_v44  ;;  %2814 = vmatprep.subr.mxu1 %v3218_v3 }
  0x13   :  { %2805 = vmatprep.subr.mxu0 %v3218_v3  ;;  %2815 = vmatpush3.msra.mxu1 %v3376_v47 }
  0x14   :  { %2806 = vmatpush3.msra.mxu0 %v265_v46  ;;  %2816 = vmatprep.subr.mxu1 %v3218_v3 }
  0x15   :  { %2807 = vmatprep.subr.mxu0 %v3218_v3  ;;  %2817 = vmatpush3.msra.mxu1 %v3387_v49 }
  0x16   :  { %2808 = vmatpush3.msra.mxu0 %v264_v48  ;;  %2818 = vmatprep.subr.mxu1 %v3218_v3 }
  0x17   :  { %2823 = vmatprep.subr.mxu0 %v3218_v3  ;;  %2819 = vmatpush3.msra.mxu1 %v3395_v50 }
  0x18   :  { %2821 = vmatmul.mubr.msk.f32.vlgmr.msra.gmra.mxu1 %vm72_vm0, %v3328_v10  ;;  %2834 = vmatprep.subr.mxu1 %v3218_v3 }
  0x19   :  { %2842 = vmatprep.mubr.msk.f32.mxu1 %vm3219_vm1, %v3218_v3 }
  0xcd   :  { %v142_v16 = vpop.f32.mrf.mxu0  ;;  %v219_v17 = vpop.f32.mrf.mxu1 }
  0xce   :  { %v149_v18 = vrot.slane %v142_v16, %v148_v15 }
  0xcf   :  { %v2789_v20 = vpop.f32.mrf.mxu0  ;;  %v2800_v21 = vpop.f32.mrf.mxu1 }
  0xd0   :  { %v220_v22 = vadd.f32 %v219_v17, %v149_v18 }
  0xd2   :  { %v229_v23 = vadd.f32 %v2610_v19, %v220_v22 }
  0xd4   :  { %v231_v24 = vsel %vm230_vm2, %v229_v23, -inf }
  0xd5   :  { %v232_v25 = vrot.slane %v231_v24, 4 }
  0xd7   :  { %v233_v26 = vmax.f32 %v231_v24, %v232_v25  ;;  %v3472_v24 = vld [vmem:[%s4007_s10 + $0x10] sm:$0xff]  ;;  %v3479_v25 = vld [vmem:[%s4007_s10 + $0x8] sm:$0xff] }
  0xd8   :  { %v408_v0 = vpop.f32.mrf.mxu1 }
  0xd9   :  { %v234_v27 = vrot.slane %v233_v26, 2 }
  0xda   :  { %v2822_v1 = vpop.f32.mrf.mxu1 }
  0xdb   :  { %v235_v28 = vmax.f32 %v233_v26, %v234_v27  ;;  %v3486_v26 = vld [vmem:[%s4007_s10] sm:$0xff] }
  0xdd   :  { %v236_v29 = vrot.slane %v235_v28, 1 }
  0xdf   :  { %v237_v30 = vmax.f32 %v235_v28, %v236_v29 }
  0xe1   :  { %v238_v31 = vsub.f32 %v229_v23, %v237_v30  ;;  %v3467_v23 = vld [vmem:[%s4007_s10 + $0x18] sm:$0xff] }
  0xe2   :  { %2835 = vmatpush3.msra.mxu1 %v3467_v23 }
  0xe3   :  { %v239_v32 = vmul.f32 1.442695, %v238_v31  ;;  %2836 = vmatprep.subr.mxu1 %v3218_v3 }
  0xe4   :  { %2837 = vmatpush3.msra.mxu1 %v3472_v24 }
  0xe5   :  { %3098 = vpow2.f32 %v239_v32  ;;  %2838 = vmatprep.subr.mxu1 %v3218_v3 }
  0xe6   :  { %2839 = vmatpush3.msra.mxu1 %v3479_v25 }
  0xe7   :  { %2840 = vmatprep.subr.mxu1 %v3218_v3 }
  0xe8   :  { %2841 = vmatpush3.msra.mxu1 %v3486_v26 }
  0xe9   :  { %2856 = vmatprep.subr.mxu1 %v3218_v3 }
  0xf2   :  { %v3099_v33 = vpop.eup %3098 }
  0xf3   :  { %v241_v34 = vsel %vm230_vm2, %v3099_v33, 0.0 }
  0xf4   :  { %v242_v35 = vrot.slane %v241_v34, 4 }
  0xf6   :  { %v243_v36 = vadd.f32 %v242_v35, %v241_v34 }
  0xf8   :  { %v244_v37 = vrot.slane %v243_v36, 2 }
  0xfa   :  { %v245_v38 = vadd.f32 %v244_v37, %v243_v36  ;;  %v3511_v36 = vld [vmem:[%s4008_s11] sm:$0x1] }
  0xfc   :  { %v246_v39 = vrot.slane %v245_v38, 1 }
  0xfe   :  { %v247_v40 = vadd.f32 %v246_v39, %v245_v38 }
 0x100   :  { %3100 = vrcp.f32 %v247_v40 }
 0x10d   :  { %v3101_v41 = vpop.eup %3100 }
 0x10e   :  { %v249_v42 = vmul.f32 %v3101_v41, %v3099_v33  ;;  %v3519_v41 = vand.u32 127, %v68_v13 }
 0x110   :  { %252 = vperm.xlu0 %3097, %v249_v42  }
 0x18b   :  { %v253_v51 = vpop.permute.xlu0 %252 }
 0x18c   :  { %v255_v52 = vmul.f32 %v253_v51, %v3333_v11  ;;  %v268_v11 = vld [vmem:[%s4004_s7] sm:$0x1] }
 0x18e   :  { %v257_v53 = vsel %vm256_vm3, %v255_v52, 0.0 }
 0x18f   :  { %v258_v54 = vrot.slane %v257_v53, 4 }
 0x191   :  { %v259_v55 = vadd.f32 %v258_v54, %v257_v53 }
 0x193   :  { %v260_v56 = vrot.slane %v259_v55, 2 }
 0x195   :  { %v261_v57 = vadd.f32 %v260_v56, %v259_v55 }
 0x197   :  { %v262_v58 = vrot.slane %v261_v57, 1 }
 0x199   :  { %v263_v59 = vadd.f32 %v262_v58, %v261_v57 }
 0x19b   :  { %2810 = vmatmul.mubr.msk.f32.vlgmr.msra.gmra.mxu0 %vm72_vm0, %v263_v59 }
 0x19c   :  { %2824 = vmatpush3.msra.mxu0 %v3407_v60  ;;  %2831 = vmatprep.mubr.msk.f32.mxu0 %vm3219_vm1, %v3218_v3 }
 0x19d   :  { %2825 = vmatprep.subr.mxu0 %v3218_v3 }
 0x19e   :  { %2826 = vmatpush3.msra.mxu0 %v3413_v61 }
 0x19f   :  { %2827 = vmatprep.subr.mxu0 %v3218_v3 }
 0x1a0   :  { %2828 = vmatpush3.msra.mxu0 %v3422_v62 }
 0x1a1   :  { %2829 = vmatprep.subr.mxu0 %v3218_v3 }
 0x1a2   :  { %2830 = vmatpush3.msra.mxu0 %v3429_v63 }
 0x1a3   :  { %2832 = vmatmul.mubr.msk.f32.vlgmr.msra.gmra.mxu0 %vm72_vm0, %v3328_v10  ;;  %2845 = vmatprep.subr.mxu0 %v3218_v3 }
 0x1a4   :  { %2846 = vmatpush3.msra.mxu0 %v3365_v45  ;;  %2853 = vmatprep.mubr.msk.f32.mxu0 %vm3219_vm1, %v3218_v3 }
 0x1a5   :  { %2847 = vmatprep.subr.mxu0 %v3218_v3 }
 0x1a6   :  { %2848 = vmatpush3.msra.mxu0 %v3376_v47 }
 0x1a7   :  { %2849 = vmatprep.subr.mxu0 %v3218_v3 }
 0x1a8   :  { %2850 = vmatpush3.msra.mxu0 %v3387_v49 }
 0x1a9   :  { %2851 = vmatprep.subr.mxu0 %v3218_v3 }
 0x1aa   :  { %2852 = vmatpush3.msra.mxu0 %v3395_v50 }
 0x1ab   :  { %2867 = vmatprep.subr.mxu0 %v3218_v3 }
 0x25b   :  { %v338_v2 = vpop.f32.mrf.mxu0 }
 0x25c   :  { %v3460_v12 = vadd.f32 %v338_v2, %v268_v11 }
 0x25d   :  { %v2811_v4 = vpop.f32.mrf.mxu0 }
 0x25e   :  { %v412_v16 = vadd.f32 %v408_v0, %v3460_v12 }
 0x263   :  { %v479_v6 = vpop.f32.mrf.mxu0 }
 0x264   :  { %v480_v7 = vadd.f32 %v479_v6, %v3450_v5 }
 0x265   :  { %v2833_v8 = vpop.f32.mrf.mxu0 }
 0x266   :  { %491 = vrot.lane.b32.xlu0 %v480_v7, %s3221_s24  ;;  %v483_v17 = vadd.f32 %v480_v7, %v412_v16 }
 0x268   :  { %v2614_v18 = vmul.f32 -1.442695, %v483_v17 }
 0x26a   :  { %511 = vrot.lane.b32.xlu0 %v510_v9, %s3222_s25  ;;  %3102 = vpow2.f32 %v2614_v18 }
 0x277   :  { %v3103_v19 = vpop.eup %3102 }
 0x278   :  { %v487_v20 = vadd.f32 1.0, %v3103_v19 }
 0x27a   :  { %3104 = vrcp.f32 %v487_v20 }
 0x287   :  { %v3105_v21 = vpop.eup %3104 }
 0x288   :  { %v501_v29 = vsub.f32 1.0, %v3105_v21 }
 0x2d8   :  { %v492_v14 = vpop.permute.xlu0 %491 }
 0x2d9   :  { %v494_v22 = vmul.f32 %v3105_v21, %v492_v14 }
 0x2db   :  { %496 = vrot.lane.b32.xlu1 %v494_v22, %s3221_s24 }
 0x2dc   :  { %v512_v28 = vpop.permute.xlu0 %511 }
 0x2dd   :  { %v514_v31 = vmul.f32 %v3105_v21, %v512_v28 }
 0x34d   :  { %v497_v10 = vpop.permute.xlu1 %496 }
 0x34e   :  { %v499_v15 = vadd.f32 %v497_v10, %v412_v16 }
 0x350   :  { %3106 = vtanh.f32 %v499_v15 }
 0x35d   :  { %v3107_v27 = vpop.eup %3106 }
 0x35e   :  { %503 = vrot.lane.b32.xlu1 %v3107_v27, %s3223_s16 }
 0x3d0   :  { %v504_v30 = vpop.permute.xlu1 %503 }
 0x3d1   :  { %v506_v32 = vmul.f32 %v504_v30, %v501_v29 }
 0x3d3   :  { %v3493_v33 = vadd.f32 %v514_v31, %v506_v32 }
 0x3d5   :  { %v516_v34 = vmax.f32 %v3493_v33, 0.0 }
 0x3d7   :  { %518 = vrot.lane.b32.xlu1 %v516_v34, %s3223_s16 }
 0x449   :  { %v519_v35 = vpop.permute.xlu1 %518 }
 0x44a   :  { %2843 = vmatmul.mubr.msk.f32.vlgmr.msra.gmra.mxu1 %vm72_vm0, %v519_v35 }
 0x44b   :  { %2857 = vmatpush3.msra.mxu1 %v3407_v60  ;;  %2864 = vmatprep.mubr.msk.f32.mxu1 %vm3219_vm1, %v3218_v3 }
 0x44c   :  { %2858 = vmatprep.subr.mxu1 %v3218_v3 }
 0x44d   :  { %2859 = vmatpush3.msra.mxu1 %v3413_v61 }
 0x44e   :  { %2860 = vmatprep.subr.mxu1 %v3218_v3 }
 0x44f   :  { %2861 = vmatpush3.msra.mxu1 %v3422_v62 }
 0x450   :  { %2862 = vmatprep.subr.mxu1 %v3218_v3 }
 0x451   :  { %2863 = vmatpush3.msra.mxu1 %v3429_v63 }
 0x452   :  { %2878 = vmatprep.subr.mxu1 %v3218_v3 }
 0x50a   :  { %v588_v37 = vpop.f32.mrf.mxu1 }
 0x50b   :  { %v3514_v38 = vadd.f32 %v588_v37, %v3511_v36 }
 0x50c   :  { %v2844_v39 = vpop.f32.mrf.mxu1 }
 0x50d   :  { %v593_v40 = vsel %vm592_vm4, %v3514_v38, -inf }
 0x50e   :  { %594 = vmax.xlane.f32.xlu0 %v593_v40 }
 0x597   :  { %v3521_v42 = vpop.xlane.xlu0 %594 }
 0x598   :  { %vm605_vm5 = vcmp.eq.f32.partialorder %v3514_v38, %v3521_v42 }
 0x599   :  { %v606_v43 = vsel %vm605_vm5, %v3519_v41, 12 }
 0x59a   :  { %v607_v44 = vsel %vm592_vm4, %v606_v43, 2147483647 }
 0x59b   :  { %v609_v46 = vshra.s32 %v607_v44, 16  ;;  %v608_v51 = vand.u32 65535, %v607_v44 }
 0x59d   :  { %v611_v48 = vcvt.s32.f32 %v609_v46  ;;  %v610_v53 = vcvt.s32.f32 %v608_v51 }
 0x59f   :  { %612 = vmin.xlane.f32.xlu1 %v611_v48 }
 0x628   :  { %v613_v52 = vpop.xlane.xlu1 %612 }
 0x629   :  { %vm614_vm6 = vcmp.eq.f32.partialorder %v611_v48, %v613_v52  ;;  %v619_v13 = vcvt.f32.s32 %v613_v52 }
 0x62a   :  { %v615_v54 = vsel %vm614_vm6, %v610_v53, inf }
 0x62b   :  { %616 = vmin.xlane.f32.xlu0 %v615_v54  ;;  %v620_v57 = vshll.u32 %v619_v13, 16 }
 0x641   :  { %700 = vrot.lane.b32.xlu0 %v3493_v33, %s3223_s16 }
 0x6b4   :  { %v617_v55 = vpop.xlane.xlu0 %616 }
 0x6b5   :  { %v618_v56 = vcvt.f32.s32 %v617_v55 }
 0x6b7   :  { %v621_v58 = vadd.s32 %v620_v57, %v618_v56 }
 0x6b8   :  { %v701_v59 = vpop.permute.xlu0 %700 }
 0x6b9   :  { %3076 = vpush %v621_v58  ;;  %2865 = vmatmul.mubr.msk.f32.vlgmr.msra.gmra.mxu1 %vm72_vm0, %v701_v59 }
 0x6ba   :  { %2879 = vmatpush3.msra.mxu1 %v3365_v45  ;;  %2886 = vmatprep.mubr.msk.f32.mxu1 %vm3219_vm1, %v3218_v3 }
 0x6bb   :  { %2880 = vmatprep.subr.mxu1 %v3218_v3 }
 0x6bc   :  { %2881 = vmatpush3.msra.mxu1 %v3376_v47 }
 0x6bd   :  { %2882 = vmatprep.subr.mxu1 %v3218_v3 }
 0x6be   :  { %2883 = vmatpush3.msra.mxu1 %v3387_v49 }
 0x6bf   :  { %2884 = vmatprep.subr.mxu1 %v3218_v3 }
 0x6c0   :  { %2885 = vmatpush3.msra.mxu1 %v3395_v50 }
 0x6c1   :  { %2900 = vmatprep.subr.mxu1 %v3218_v3 }
 0x6ea   :  { %s3077_s18 = spop %3076 }
 0x6eb   :  { %s623_s21 = scalar_lea.vmem %s3998_s1, %s3077_s18 }
 0x6ec   :  { %v624_v0 = vld [vmem:[%s623_s21] sm:$0x1] }
 0x6ed   :  { %2854 = vmatmul.mubr.msk.f32.vlgmr.msra.gmra.mxu0 %vm72_vm0, %v624_v0 }
 0x6ee   :  { %2868 = vmatpush3.msra.mxu0 %v3467_v23  ;;  %2875 = vmatprep.mubr.msk.f32.mxu0 %vm3219_vm1, %v3218_v3 }
 0x6ef   :  { %2869 = vmatprep.subr.mxu0 %v3218_v3 }
 0x6f0   :  { %2870 = vmatpush3.msra.mxu0 %v3472_v24 }
 0x6f1   :  { %2871 = vmatprep.subr.mxu0 %v3218_v3 }
 0x6f2   :  { %2872 = vmatpush3.msra.mxu0 %v3479_v25 }
 0x6f3   :  { %2873 = vmatprep.subr.mxu0 %v3218_v3 }
 0x6f4   :  { %2874 = vmatpush3.msra.mxu0 %v3486_v26 }
 0x6f5   :  { %2889 = vmatprep.subr.mxu0 %v3218_v3 }
 0x779   :  { %v770_v1 = vpop.f32.mrf.mxu1 }
 0x77a   :  { %v771_v2 = vadd.f32 %v770_v1, %v3450_v5 }
 0x77b   :  { %v2866_v4 = vpop.f32.mrf.mxu1 }
 0x77c   :  { %782 = vrot.lane.b32.xlu1 %v771_v2, %s3221_s24 }
 0x7ad   :  { %v694_v6 = vpop.f32.mrf.mxu0 }
 0x7ae   :  { %v698_v8 = vadd.f32 %v694_v6, %v3460_v12 }
 0x7af   :  { %v2855_v7 = vpop.f32.mrf.mxu0 }
 0x7b0   :  { %v774_v9 = vadd.f32 %v771_v2, %v698_v8 }
 0x7b2   :  { %v2618_v11 = vmul.f32 -1.442695, %v774_v9 }
 0x7b4   :  { %3108 = vpow2.f32 %v2618_v11 }
 0x7c1   :  { %v3109_v16 = vpop.eup %3108 }
 0x7c2   :  { %v778_v17 = vadd.f32 1.0, %v3109_v16 }
 0x7c4   :  { %3110 = vrcp.f32 %v778_v17 }
 0x7d1   :  { %v3111_v18 = vpop.eup %3110 }
 0x7d2   :  { %v792_v10 = vsub.f32 1.0, %v3111_v18  ;;  %v798_v27 = vmul.f32 %v3111_v18, %v3493_v33 }
 0x7ee   :  { %v783_v19 = vpop.permute.xlu1 %782 }
 0x7ef   :  { %v785_v20 = vmul.f32 %v3111_v18, %v783_v19 }
 0x7f1   :  { %787 = vrot.lane.b32.xlu1 %v785_v20, %s3221_s24 }
 0x863   :  { %v788_v21 = vpop.permute.xlu1 %787 }
 0x864   :  { %v790_v14 = vadd.f32 %v788_v21, %v698_v8 }
 0x866   :  { %3112 = vtanh.f32 %v790_v14 }
 0x873   :  { %v3113_v22 = vpop.eup %3112 }
 0x874   :  { %794 = vrot.lane.b32.xlu0 %v3113_v22, %s3223_s16 }
 0x8e6   :  { %v795_v15 = vpop.permute.xlu0 %794 }
 0x8e7   :  { %v797_v28 = vmul.f32 %v795_v15, %v792_v10 }
 0x8e9   :  { %v3560_v29 = vadd.f32 %v798_v27, %v797_v28 }
 0x8eb   :  { %v800_v30 = vmax.f32 %v3560_v29, 0.0 }
 0x8ed   :  { %802 = vrot.lane.b32.xlu1 %v800_v30, %s3223_s16 }
 0x95f   :  { %v803_v31 = vpop.permute.xlu1 %802 }
 0x960   :  { %2876 = vmatmul.mubr.msk.f32.vlgmr.msra.gmra.mxu0 %vm72_vm0, %v803_v31 }
 0x961   :  { %2890 = vmatpush3.msra.mxu0 %v3407_v60  ;;  %2897 = vmatprep.mubr.msk.f32.mxu0 %vm3219_vm1, %v3218_v3 }
 0x962   :  { %2891 = vmatprep.subr.mxu0 %v3218_v3 }
 0x963   :  { %2892 = vmatpush3.msra.mxu0 %v3413_v61 }
 0x964   :  { %2893 = vmatprep.subr.mxu0 %v3218_v3 }
 0x965   :  { %2894 = vmatpush3.msra.mxu0 %v3422_v62 }
 0x966   :  { %2895 = vmatprep.subr.mxu0 %v3218_v3 }
 0x967   :  { %2896 = vmatpush3.msra.mxu0 %v3429_v63 }
 0x968   :  { %2911 = vmatprep.subr.mxu0 %v3218_v3 }
 0xa20   :  { %v872_v32 = vpop.f32.mrf.mxu0 }
 0xa21   :  { %v3576_v33 = vadd.f32 %v872_v32, %v3511_v36 }
 0xa22   :  { %v2877_v34 = vpop.f32.mrf.mxu0 }
 0xa23   :  { %v876_v35 = vsel %vm592_vm4, %v3576_v33, -inf }
 0xa24   :  { %877 = vmax.xlane.f32.xlu0 %v876_v35 }
 0xaad   :  { %v3580_v37 = vpop.xlane.xlu0 %877 }
 0xaae   :  { %vm888_vm7 = vcmp.eq.f32.partialorder %v3576_v33, %v3580_v37 }
 0xaaf   :  { %v889_v39 = vsel %vm888_vm7, %v3519_v41, 12 }
 0xab0   :  { %v890_v40 = vsel %vm592_vm4, %v889_v39, 2147483647 }
 0xab1   :  { %v892_v43 = vshra.s32 %v890_v40, 16  ;;  %v891_v46 = vand.u32 65535, %v890_v40 }
 0xab3   :  { %v894_v44 = vcvt.s32.f32 %v892_v43  ;;  %v893_v51 = vcvt.s32.f32 %v891_v46 }
 0xab5   :  { %895 = vmin.xlane.f32.xlu1 %v894_v44 }
 0xb3e   :  { %v896_v48 = vpop.xlane.xlu1 %895 }
 0xb3f   :  { %vm897_vm8 = vcmp.eq.f32.partialorder %v894_v44, %v896_v48  ;;  %v902_v53 = vcvt.f32.s32 %v896_v48 }
 0xb40   :  { %v898_v52 = vsel %vm897_vm8, %v893_v51, inf }
 0xb41   :  { %899 = vmin.xlane.f32.xlu0 %v898_v52  ;;  %v903_v13 = vshll.u32 %v902_v53, 16 }
 0xb57   :  { %983 = vrot.lane.b32.xlu0 %v3560_v29, %s3223_s16 }
 0xbca   :  { %v900_v54 = vpop.xlane.xlu0 %899 }
 0xbcb   :  { %v901_v55 = vcvt.f32.s32 %v900_v54 }
 0xbcd   :  { %v904_v56 = vadd.s32 %v903_v13, %v901_v55 }
 0xbce   :  { %v984_v57 = vpop.permute.xlu0 %983 }
 0xbcf   :  { %3078 = vpush %v904_v56  ;;  %2898 = vmatmul.mubr.msk.f32.vlgmr.msra.gmra.mxu0 %vm72_vm0, %v984_v57 }
 0xbd0   :  { %2912 = vmatpush3.msra.mxu0 %v3365_v45  ;;  %2919 = vmatprep.mubr.msk.f32.mxu0 %vm3219_vm1, %v3218_v3 }
 0xbd1   :  { %2913 = vmatprep.subr.mxu0 %v3218_v3 }
 0xbd2   :  { %2914 = vmatpush3.msra.mxu0 %v3376_v47 }
 0xbd3   :  { %2915 = vmatprep.subr.mxu0 %v3218_v3 }
 0xbd4   :  { %2916 = vmatpush3.msra.mxu0 %v3387_v49 }
 0xbd5   :  { %2917 = vmatprep.subr.mxu0 %v3218_v3 }
 0xbd6   :  { %2918 = vmatpush3.msra.mxu0 %v3395_v50 }
 0xbd7   :  { %2933 = vmatprep.subr.mxu0 %v3218_v3 }
 0xc00   :  { %s3079_s22 = spop %3078 }
 0xc01   :  { %s906_s2 = scalar_lea.vmem %s3998_s1, %s3079_s22 }
 0xc02   :  { %v907_v58 = vld [vmem:[%s906_s2] sm:$0x1] }
 0xc03   :  { %2887 = vmatmul.mubr.msk.f32.vlgmr.msra.gmra.mxu1 %vm72_vm0, %v907_v58 }
 0xc04   :  { %2901 = vmatpush3.msra.mxu1 %v3467_v23  ;;  %2908 = vmatprep.mubr.msk.f32.mxu1 %vm3219_vm1, %v3218_v3 }
 0xc05   :  { %2902 = vmatprep.subr.mxu1 %v3218_v3 }
 0xc06   :  { %2903 = vmatpush3.msra.mxu1 %v3472_v24 }
 0xc07   :  { %2904 = vmatprep.subr.mxu1 %v3218_v3 }
 0xc08   :  { %2905 = vmatpush3.msra.mxu1 %v3479_v25 }
 0xc09   :  { %2906 = vmatprep.subr.mxu1 %v3218_v3 }
 0xc0a   :  { %2907 = vmatpush3.msra.mxu1 %v3486_v26 }
 0xc0b   :  { %2922 = vmatprep.subr.mxu1 %v3218_v3 }
 0xc8f   :  { %v1053_v59 = vpop.f32.mrf.mxu0 }
 0xc90   :  { %v1054_v0 = vadd.f32 %v1053_v59, %v3450_v5 }
 0xc91   :  { %v2899_v1 = vpop.f32.mrf.mxu0 }
 0xc92   :  { %1065 = vrot.lane.b32.xlu1 %v1054_v0, %s3221_s24 }
 0xcc3   :  { %v977_v2 = vpop.f32.mrf.mxu1 }
 0xcc4   :  { %v981_v6 = vadd.f32 %v977_v2, %v3460_v12 }
 0xcc5   :  { %v2888_v4 = vpop.f32.mrf.mxu1 }
 0xcc6   :  { %v1057_v7 = vadd.f32 %v1054_v0, %v981_v6 }
 0xcc8   :  { %v2622_v8 = vmul.f32 -1.442695, %v1057_v7 }
 0xcca   :  { %3114 = vpow2.f32 %v2622_v8 }
 0xcd7   :  { %v3115_v9 = vpop.eup %3114 }
 0xcd8   :  { %v1061_v11 = vadd.f32 1.0, %v3115_v9 }
 0xcda   :  { %3116 = vrcp.f32 %v1061_v11 }
 0xce7   :  { %v3117_v16 = vpop.eup %3116 }
 0xce8   :  { %v1075_v14 = vsub.f32 1.0, %v3117_v16  ;;  %v1081_v10 = vmul.f32 %v3117_v16, %v3560_v29 }
 0xd04   :  { %v1066_v17 = vpop.permute.xlu1 %1065 }
 0xd05   :  { %v1068_v18 = vmul.f32 %v3117_v16, %v1066_v17 }
 0xd07   :  { %1070 = vrot.lane.b32.xlu1 %v1068_v18, %s3221_s24 }
 0xd79   :  { %v1071_v19 = vpop.permute.xlu1 %1070 }
 0xd7a   :  { %v1073_v20 = vadd.f32 %v1071_v19, %v981_v6 }
 0xd7c   :  { %3118 = vtanh.f32 %v1073_v20 }
 0xd89   :  { %v3119_v21 = vpop.eup %3118 }
 0xd8a   :  { %1077 = vrot.lane.b32.xlu0 %v3119_v21, %s3223_s16 }
 0xdfc   :  { %v1078_v22 = vpop.permute.xlu0 %1077 }
 0xdfd   :  { %v1080_v15 = vmul.f32 %v1078_v22, %v1075_v14 }
 0xdff   :  { %v3619_v27 = vadd.f32 %v1081_v10, %v1080_v15 }
 0xe01   :  { %v1083_v28 = vmax.f32 %v3619_v27, 0.0 }
 0xe03   :  { %1085 = vrot.lane.b32.xlu1 %v1083_v28, %s3223_s16 }
 0xe75   :  { %v1086_v30 = vpop.permute.xlu1 %1085 }
 0xe76   :  { %2909 = vmatmul.mubr.msk.f32.vlgmr.msra.gmra.mxu1 %vm72_vm0, %v1086_v30 }
 0xe77   :  { %2923 = vmatpush3.msra.mxu1 %v3407_v60  ;;  %2930 = vmatprep.mubr.msk.f32.mxu1 %vm3219_vm1, %v3218_v3 }
 0xe78   :  { %2924 = vmatprep.subr.mxu1 %v3218_v3 }
 0xe79   :  { %2925 = vmatpush3.msra.mxu1 %v3413_v61 }
 0xe7a   :  { %2926 = vmatprep.subr.mxu1 %v3218_v3 }
 0xe7b   :  { %2927 = vmatpush3.msra.mxu1 %v3422_v62 }
 0xe7c   :  { %2928 = vmatprep.subr.mxu1 %v3218_v3 }
 0xe7d   :  { %2929 = vmatpush3.msra.mxu1 %v3429_v63 }
 0xe7e   :  { %2944 = vmatprep.subr.mxu1 %v3218_v3 }
 0xf36   :  { %v1155_v29 = vpop.f32.mrf.mxu1 }
 0xf37   :  { %v3635_v31 = vadd.f32 %v1155_v29, %v3511_v36 }
 0xf38   :  { %v2910_v32 = vpop.f32.mrf.mxu1 }
 0xf39   :  { %v1159_v34 = vsel %vm592_vm4, %v3635_v31, -inf }
 0xf3a   :  { %1160 = vmax.xlane.f32.xlu0 %v1159_v34 }
 0xfc3   :  { %v3639_v35 = vpop.xlane.xlu0 %1160 }
 0xfc4   :  { %vm1171_vm9 = vcmp.eq.f32.partialorder %v3635_v31, %v3639_v35 }
 0xfc5   :  { %v1172_v39 = vsel %vm1171_vm9, %v3519_v41, 12 }
 0xfc6   :  { %v1173_v40 = vsel %vm592_vm4, %v1172_v39, 2147483647 }
 0xfc7   :  { %v1175_v43 = vshra.s32 %v1173_v40, 16  ;;  %v1174_v46 = vand.u32 65535, %v1173_v40 }
 0xfc9   :  { %v1177_v44 = vcvt.s32.f32 %v1175_v43  ;;  %v1176_v51 = vcvt.s32.f32 %v1174_v46 }
 0xfcb   :  { %1178 = vmin.xlane.f32.xlu1 %v1177_v44 }
0x1054   :  { %v1179_v48 = vpop.xlane.xlu1 %1178 }
0x1055   :  { %vm1180_vm10 = vcmp.eq.f32.partialorder %v1177_v44, %v1179_v48  ;;  %v1185_v53 = vcvt.f32.s32 %v1179_v48 }
0x1056   :  { %v1181_v52 = vsel %vm1180_vm10, %v1176_v51, inf }
0x1057   :  { %1182 = vmin.xlane.f32.xlu0 %v1181_v52  ;;  %v1186_v13 = vshll.u32 %v1185_v53, 16 }
0x106d   :  { %1266 = vrot.lane.b32.xlu0 %v3619_v27, %s3223_s16 }
0x10e0   :  { %v1183_v54 = vpop.xlane.xlu0 %1182 }
0x10e1   :  { %v1184_v55 = vcvt.f32.s32 %v1183_v54 }
0x10e3   :  { %v1187_v56 = vadd.s32 %v1186_v13, %v1184_v55 }
0x10e4   :  { %v1267_v57 = vpop.permute.xlu0 %1266 }
0x10e5   :  { %3080 = vpush %v1187_v56  ;;  %2931 = vmatmul.mubr.msk.f32.vlgmr.msra.gmra.mxu1 %vm72_vm0, %v1267_v57 }
0x10e6   :  { %2945 = vmatpush3.msra.mxu1 %v3365_v45  ;;  %2952 = vmatprep.mubr.msk.f32.mxu1 %vm3219_vm1, %v3218_v3 }
0x10e7   :  { %2946 = vmatprep.subr.mxu1 %v3218_v3 }
0x10e8   :  { %2947 = vmatpush3.msra.mxu1 %v3376_v47 }
0x10e9   :  { %2948 = vmatprep.subr.mxu1 %v3218_v3 }
0x10ea   :  { %2949 = vmatpush3.msra.mxu1 %v3387_v49 }
0x10eb   :  { %2950 = vmatprep.subr.mxu1 %v3218_v3 }
0x10ec   :  { %2951 = vmatpush3.msra.mxu1 %v3395_v50 }
0x10ed   :  { %2966 = vmatprep.subr.mxu1 %v3218_v3 }
0x1116   :  { %s3081_s3 = spop %3080 }
0x1117   :  { %s1189_s27 = scalar_lea.vmem %s3998_s1, %s3081_s3 }
0x1118   :  { %v1190_v58 = vld [vmem:[%s1189_s27] sm:$0x1] }
0x1119   :  { %2920 = vmatmul.mubr.msk.f32.vlgmr.msra.gmra.mxu0 %vm72_vm0, %v1190_v58 }
0x111a   :  { %2934 = vmatpush3.msra.mxu0 %v3467_v23  ;;  %2941 = vmatprep.mubr.msk.f32.mxu0 %vm3219_vm1, %v3218_v3 }
0x111b   :  { %2935 = vmatprep.subr.mxu0 %v3218_v3 }
0x111c   :  { %2936 = vmatpush3.msra.mxu0 %v3472_v24 }
0x111d   :  { %2937 = vmatprep.subr.mxu0 %v3218_v3 }
0x111e   :  { %2938 = vmatpush3.msra.mxu0 %v3479_v25 }
0x111f   :  { %2939 = vmatprep.subr.mxu0 %v3218_v3 }
0x1120   :  { %2940 = vmatpush3.msra.mxu0 %v3486_v26 }
0x1121   :  { %2955 = vmatprep.subr.mxu0 %v3218_v3 }
0x11a5   :  { %v1336_v59 = vpop.f32.mrf.mxu1 }
0x11a6   :  { %v1337_v0 = vadd.f32 %v1336_v59, %v3450_v5 }
0x11a7   :  { %v2932_v1 = vpop.f32.mrf.mxu1 }
0x11a8   :  { %1348 = vrot.lane.b32.xlu1 %v1337_v0, %s3221_s24 }
0x11d9   :  { %v1260_v2 = vpop.f32.mrf.mxu0 }
0x11da   :  { %v1264_v6 = vadd.f32 %v1260_v2, %v3460_v12 }
0x11db   :  { %v2921_v4 = vpop.f32.mrf.mxu0 }
0x11dc   :  { %v1340_v7 = vadd.f32 %v1337_v0, %v1264_v6 }
0x11de   :  { %v2626_v8 = vmul.f32 -1.442695, %v1340_v7 }
0x11e0   :  { %3120 = vpow2.f32 %v2626_v8 }
0x11ed   :  { %v3121_v9 = vpop.eup %3120 }
0x11ee   :  { %v1344_v11 = vadd.f32 1.0, %v3121_v9 }
0x11f0   :  { %3122 = vrcp.f32 %v1344_v11 }
0x11fd   :  { %v3123_v16 = vpop.eup %3122 }
0x11fe   :  { %v1358_v14 = vsub.f32 1.0, %v3123_v16  ;;  %v1364_v10 = vmul.f32 %v3123_v16, %v3619_v27 }
0x121a   :  { %v1349_v17 = vpop.permute.xlu1 %1348 }
0x121b   :  { %v1351_v18 = vmul.f32 %v3123_v16, %v1349_v17 }
0x121d   :  { %1353 = vrot.lane.b32.xlu1 %v1351_v18, %s3221_s24 }
0x128f   :  { %v1354_v19 = vpop.permute.xlu1 %1353 }
0x1290   :  { %v1356_v20 = vadd.f32 %v1354_v19, %v1264_v6 }
0x1292   :  { %3124 = vtanh.f32 %v1356_v20 }
0x129f   :  { %v3125_v21 = vpop.eup %3124 }
0x12a0   :  { %1360 = vrot.lane.b32.xlu0 %v3125_v21, %s3223_s16 }
0x1312   :  { %v1361_v22 = vpop.permute.xlu0 %1360 }
0x1313   :  { %v1363_v15 = vmul.f32 %v1361_v22, %v1358_v14 }
0x1315   :  { %v3678_v28 = vadd.f32 %v1364_v10, %v1363_v15 }
0x1317   :  { %v1366_v30 = vmax.f32 %v3678_v28, 0.0 }
0x1319   :  { %1368 = vrot.lane.b32.xlu1 %v1366_v30, %s3223_s16 }
0x138b   :  { %v1369_v29 = vpop.permute.xlu1 %1368 }
0x138c   :  { %2942 = vmatmul.mubr.msk.f32.vlgmr.msra.gmra.mxu0 %vm72_vm0, %v1369_v29 }
0x138d   :  { %2956 = vmatpush3.msra.mxu0 %v3407_v60  ;;  %2963 = vmatprep.mubr.msk.f32.mxu0 %vm3219_vm1, %v3218_v3 }
0x138e   :  { %2957 = vmatprep.subr.mxu0 %v3218_v3 }
0x138f   :  { %2958 = vmatpush3.msra.mxu0 %v3413_v61 }
0x1390   :  { %2959 = vmatprep.subr.mxu0 %v3218_v3 }
0x1391   :  { %2960 = vmatpush3.msra.mxu0 %v3422_v62 }
0x1392   :  { %2961 = vmatprep.subr.mxu0 %v3218_v3 }
0x1393   :  { %2962 = vmatpush3.msra.mxu0 %v3429_v63 }
0x1394   :  { %2977 = vmatprep.subr.mxu0 %v3218_v3 }
0x144c   :  { %v1438_v27 = vpop.f32.mrf.mxu0 }
0x144d   :  { %v3694_v32 = vadd.f32 %v1438_v27, %v3511_v36 }
0x144e   :  { %v2943_v34 = vpop.f32.mrf.mxu0 }
0x144f   :  { %v1442_v39 = vsel %vm592_vm4, %v3694_v32, -inf }
0x1450   :  { %1443 = vmax.xlane.f32.xlu0 %v1442_v39 }
0x14d9   :  { %v3698_v40 = vpop.xlane.xlu0 %1443 }
0x14da   :  { %vm1454_vm11 = vcmp.eq.f32.partialorder %v3694_v32, %v3698_v40 }
0x14db   :  { %v1455_v43 = vsel %vm1454_vm11, %v3519_v41, 12 }
0x14dc   :  { %v1456_v44 = vsel %vm592_vm4, %v1455_v43, 2147483647 }
0x14dd   :  { %v1458_v46 = vshra.s32 %v1456_v44, 16  ;;  %v1457_v51 = vand.u32 65535, %v1456_v44 }
0x14df   :  { %v1460_v48 = vcvt.s32.f32 %v1458_v46  ;;  %v1459_v53 = vcvt.s32.f32 %v1457_v51 }
0x14e1   :  { %1461 = vmin.xlane.f32.xlu1 %v1460_v48 }
0x156a   :  { %v1462_v52 = vpop.xlane.xlu1 %1461 }
0x156b   :  { %vm1463_vm12 = vcmp.eq.f32.partialorder %v1460_v48, %v1462_v52  ;;  %v1468_v13 = vcvt.f32.s32 %v1462_v52 }
0x156c   :  { %v1464_v54 = vsel %vm1463_vm12, %v1459_v53, inf }
0x156d   :  { %1465 = vmin.xlane.f32.xlu0 %v1464_v54  ;;  %v1469_v56 = vshll.u32 %v1468_v13, 16 }
0x1583   :  { %1549 = vrot.lane.b32.xlu0 %v3678_v28, %s3223_s16 }
0x15f6   :  { %v1466_v55 = vpop.xlane.xlu0 %1465 }
0x15f7   :  { %v1467_v57 = vcvt.f32.s32 %v1466_v55 }
0x15f9   :  { %v1470_v58 = vadd.s32 %v1469_v56, %v1467_v57 }
0x15fa   :  { %v1550_v59 = vpop.permute.xlu0 %1549 }
0x15fb   :  { %3082 = vpush %v1470_v58  ;;  %2964 = vmatmul.mubr.msk.f32.vlgmr.msra.gmra.mxu0 %vm72_vm0, %v1550_v59 }
0x15fc   :  { %2978 = vmatpush3.msra.mxu0 %v3365_v45  ;;  %2985 = vmatprep.mubr.msk.f32.mxu0 %vm3219_vm1, %v3218_v3 }
0x15fd   :  { %2979 = vmatprep.subr.mxu0 %v3218_v3 }
0x15fe   :  { %2980 = vmatpush3.msra.mxu0 %v3376_v47 }
0x15ff   :  { %2981 = vmatprep.subr.mxu0 %v3218_v3 }
0x1600   :  { %2982 = vmatpush3.msra.mxu0 %v3387_v49 }
0x1601   :  { %2983 = vmatprep.subr.mxu0 %v3218_v3 }
0x1602   :  { %2984 = vmatpush3.msra.mxu0 %v3395_v50 }
0x1603   :  { %2999 = vmatprep.subr.mxu0 %v3218_v3 }
0x162c   :  { %s3083_s28 = spop %3082 }
0x162d   :  { %s1472_s4 = scalar_lea.vmem %s3998_s1, %s3083_s28 }
0x162e   :  { %v1473_v0 = vld [vmem:[%s1472_s4] sm:$0x1] }
0x162f   :  { %2953 = vmatmul.mubr.msk.f32.vlgmr.msra.gmra.mxu1 %vm72_vm0, %v1473_v0 }
0x1630   :  { %2967 = vmatpush3.msra.mxu1 %v3467_v23  ;;  %2974 = vmatprep.mubr.msk.f32.mxu1 %vm3219_vm1, %v3218_v3 }
0x1631   :  { %2968 = vmatprep.subr.mxu1 %v3218_v3 }
0x1632   :  { %2969 = vmatpush3.msra.mxu1 %v3472_v24 }
0x1633   :  { %2970 = vmatprep.subr.mxu1 %v3218_v3 }
0x1634   :  { %2971 = vmatpush3.msra.mxu1 %v3479_v25 }
0x1635   :  { %2972 = vmatprep.subr.mxu1 %v3218_v3 }
0x1636   :  { %2973 = vmatpush3.msra.mxu1 %v3486_v26 }
0x1637   :  { %2988 = vmatprep.subr.mxu1 %v3218_v3 }
0x16bb   :  { %v1619_v1 = vpop.f32.mrf.mxu0 }
0x16bc   :  { %v1620_v2 = vadd.f32 %v1619_v1, %v3450_v5 }
0x16bd   :  { %v2965_v4 = vpop.f32.mrf.mxu0 }
0x16be   :  { %1631 = vrot.lane.b32.xlu1 %v1620_v2, %s3221_s24 }
0x16ef   :  { %v1543_v6 = vpop.f32.mrf.mxu1 }
0x16f0   :  { %v1547_v8 = vadd.f32 %v1543_v6, %v3460_v12 }
0x16f1   :  { %v2954_v7 = vpop.f32.mrf.mxu1 }
0x16f2   :  { %v1623_v9 = vadd.f32 %v1620_v2, %v1547_v8 }
0x16f4   :  { %v2630_v11 = vmul.f32 -1.442695, %v1623_v9 }
0x16f6   :  { %3126 = vpow2.f32 %v2630_v11 }
0x1703   :  { %v3127_v16 = vpop.eup %3126 }
0x1704   :  { %v1627_v17 = vadd.f32 1.0, %v3127_v16 }
0x1706   :  { %3128 = vrcp.f32 %v1627_v17 }
0x1713   :  { %v3129_v18 = vpop.eup %3128 }
0x1714   :  { %v1641_v10 = vsub.f32 1.0, %v3129_v18  ;;  %v1647_v30 = vmul.f32 %v3129_v18, %v3678_v28 }
0x1730   :  { %v1632_v19 = vpop.permute.xlu1 %1631 }
0x1731   :  { %v1634_v20 = vmul.f32 %v3129_v18, %v1632_v19 }
0x1733   :  { %1636 = vrot.lane.b32.xlu1 %v1634_v20, %s3221_s24 }
0x17a5   :  { %v1637_v21 = vpop.permute.xlu1 %1636 }
0x17a6   :  { %v1639_v14 = vadd.f32 %v1637_v21, %v1547_v8 }
0x17a8   :  { %3130 = vtanh.f32 %v1639_v14  ;;  %v3804_v14 = vld [vmem:[%s4005_s8 + $0x18] sm:$0xff] }
0x17b5   :  { %v3131_v22 = vpop.eup %3130 }
0x17b6   :  { %1643 = vrot.lane.b32.xlu0 %v3131_v22, %s3223_s16  ;;  %v3813_v22 = vld [vmem:[%s4005_s8 + $0x10] sm:$0xff] }
0x1828   :  { %v1644_v15 = vpop.permute.xlu0 %1643 }
0x1829   :  { %v1646_v29 = vmul.f32 %v1644_v15, %v1641_v10  ;;  %v3820_v10 = vld [vmem:[%s4005_s8 + $0x8] sm:$0xff]  ;;  %v3827_v15 = vld [vmem:[%s4005_s8] sm:$0xff] }
0x182b   :  { %v3737_v27 = vadd.f32 %v1647_v30, %v1646_v29 }
0x182d   :  { %v1649_v34 = vmax.f32 %v3737_v27, 0.0 }
0x182f   :  { %1651 = vrot.lane.b32.xlu1 %v1649_v34, %s3223_s16 }
0x18a1   :  { %v1652_v39 = vpop.permute.xlu1 %1651 }
0x18a2   :  { %2975 = vmatmul.mubr.msk.f32.vlgmr.msra.gmra.mxu1 %vm72_vm0, %v1652_v39 }
0x18a3   :  { %2989 = vmatpush3.msra.mxu1 %v3407_v60  ;;  %2996 = vmatprep.mubr.msk.f32.mxu1 %vm3219_vm1, %v3218_v3 }
0x18a4   :  { %2990 = vmatprep.subr.mxu1 %v3218_v3 }
0x18a5   :  { %2991 = vmatpush3.msra.mxu1 %v3413_v61 }
0x18a6   :  { %2992 = vmatprep.subr.mxu1 %v3218_v3 }
0x18a7   :  { %2993 = vmatpush3.msra.mxu1 %v3422_v62 }
0x18a8   :  { %2994 = vmatprep.subr.mxu1 %v3218_v3 }
0x18a9   :  { %2995 = vmatpush3.msra.mxu1 %v3429_v63 }
0x18aa   :  { %3010 = vmatprep.subr.mxu1 %v3218_v3 }
0x1962   :  { %v1721_v28 = vpop.f32.mrf.mxu1 }
0x1963   :  { %v3753_v60 = vadd.f32 %v1721_v28, %v3511_v36 }
0x1964   :  { %v2976_v43 = vpop.f32.mrf.mxu1 }
0x1965   :  { %v1725_v44 = vsel %vm592_vm4, %v3753_v60, -inf }
0x1966   :  { %1726 = vmax.xlane.f32.xlu0 %v1725_v44 }
0x19ef   :  { %v3757_v61 = vpop.xlane.xlu0 %1726 }
0x19f0   :  { %vm1737_vm13 = vcmp.eq.f32.partialorder %v3753_v60, %v3757_v61 }
0x19f1   :  { %v1738_v62 = vsel %vm1737_vm13, %v3519_v41, 12 }
0x19f2   :  { %v1739_v63 = vsel %vm592_vm4, %v1738_v62, 2147483647 }
0x19f3   :  { %v1741_v46 = vshra.s32 %v1739_v63, 16  ;;  %v1740_v51 = vand.u32 65535, %v1739_v63 }
0x19f5   :  { %v1743_v48 = vcvt.s32.f32 %v1741_v46  ;;  %v1742_v53 = vcvt.s32.f32 %v1740_v51 }
0x19f7   :  { %1744 = vmin.xlane.f32.xlu1 %v1743_v48 }
0x1a80   :  { %v1745_v52 = vpop.xlane.xlu1 %1744 }
0x1a81   :  { %vm1746_vm14 = vcmp.eq.f32.partialorder %v1743_v48, %v1745_v52  ;;  %v1751_v13 = vcvt.f32.s32 %v1745_v52 }
0x1a82   :  { %v1747_v54 = vsel %vm1746_vm14, %v1742_v53, inf }
0x1a83   :  { %1748 = vmin.xlane.f32.xlu0 %v1747_v54  ;;  %v1752_v56 = vshll.u32 %v1751_v13, 16 }
0x1a99   :  { %1832 = vrot.lane.b32.xlu0 %v3737_v27, %s3223_s16 }
0x1b0c   :  { %v1749_v55 = vpop.xlane.xlu0 %1748 }
0x1b0d   :  { %v1750_v57 = vcvt.f32.s32 %v1749_v55 }
0x1b0f   :  { %v1753_v58 = vadd.s32 %v1752_v56, %v1750_v57  ;;  %v3186_v56 = vld [vmem:[%s4003_s6 + $0x18] sm:$0xff]  ;;  %v3187_v57 = vld [vmem:[%s4003_s6 + $0x10] sm:$0xff] }
0x1b10   :  { %v1833_v59 = vpop.permute.xlu0 %1832 }
0x1b11   :  { %3084 = vpush %v1753_v58  ;;  %2997 = vmatmul.mubr.msk.f32.vlgmr.msra.gmra.mxu1 %vm72_vm0, %v1833_v59  ;;  %v3188_v58 = vld [vmem:[%s4003_s6 + $0x8] sm:$0xff]  ;;  %v3189_v59 = vld [vmem:[%s4003_s6] sm:$0xff] }
0x1b12   :  { %3011 = vmatpush3.msra.mxu1 %v3365_v45  ;;  %3018 = vmatprep.mubr.msk.f32.mxu1 %vm3219_vm1, %v3218_v3 }
0x1b13   :  { %3012 = vmatprep.subr.mxu1 %v3218_v3 }
0x1b14   :  { %3013 = vmatpush3.msra.mxu1 %v3376_v47 }
0x1b15   :  { %3014 = vmatprep.subr.mxu1 %v3218_v3 }
0x1b16   :  { %3015 = vmatpush3.msra.mxu1 %v3387_v49 }
0x1b17   :  { %3016 = vmatprep.subr.mxu1 %v3218_v3 }
0x1b18   :  { %3017 = vmatpush3.msra.mxu1 %v3395_v50 }
0x1b19   :  { %3032 = vmatprep.subr.mxu1 %v3218_v3 }
0x1b42   :  { %s3085_s30 = spop %3084 }
0x1b43   :  { %s1755_s15 = scalar_lea.vmem %s3998_s1, %s3085_s30 }
0x1b44   :  { %v1756_v45 = vld [vmem:[%s1755_s15] sm:$0x1] }
0x1b45   :  { %2986 = vmatmul.mubr.msk.f32.vlgmr.msra.gmra.mxu0 %vm72_vm0, %v1756_v45 }
0x1b46   :  { %3000 = vmatpush3.msra.mxu0 %v3467_v23  ;;  %3007 = vmatprep.mubr.msk.f32.mxu0 %vm3219_vm1, %v3218_v3 }
0x1b47   :  { %3001 = vmatprep.subr.mxu0 %v3218_v3 }
0x1b48   :  { %3002 = vmatpush3.msra.mxu0 %v3472_v24 }
0x1b49   :  { %3003 = vmatprep.subr.mxu0 %v3218_v3 }
0x1b4a   :  { %3004 = vmatpush3.msra.mxu0 %v3479_v25 }
0x1b4b   :  { %3005 = vmatprep.subr.mxu0 %v3218_v3 }
0x1b4c   :  { %3006 = vmatpush3.msra.mxu0 %v3486_v26 }
0x1b4d   :  { %3021 = vmatprep.subr.mxu0 %v3218_v3 }
0x1bd1   :  { %v1902_v47 = vpop.f32.mrf.mxu1 }
0x1bd2   :  { %v1903_v49 = vadd.f32 %v1902_v47, %v3450_v5  ;;  %v3870_v47 = vld [vmem:[%s4007_s10 + $0x18] sm:$0xff] }
0x1bd3   :  { %v2998_v50 = vpop.f32.mrf.mxu1 }
0x1bd4   :  { %1914 = vrot.lane.b32.xlu1 %v1903_v49, %s3221_s24  ;;  %v3886_v50 = vld [vmem:[%s4007_s10 + $0x8] sm:$0xff] }
0x1c05   :  { %v1826_v23 = vpop.f32.mrf.mxu0 }
0x1c06   :  { %v1830_v24 = vadd.f32 %v1826_v23, %v3460_v12  ;;  %v3893_v23 = vld [vmem:[%s4007_s10] sm:$0xff] }
0x1c07   :  { %v2987_v0 = vpop.f32.mrf.mxu0 }
0x1c08   :  { %v1906_v1 = vadd.f32 %v1903_v49, %v1830_v24  ;;  %v3879_v49 = vld [vmem:[%s4007_s10 + $0x10] sm:$0xff] }
0x1c0a   :  { %v2634_v2 = vmul.f32 -1.442695, %v1906_v1 }
0x1c0c   :  { %3132 = vpow2.f32 %v2634_v2 }
0x1c19   :  { %v3133_v25 = vpop.eup %3132 }
0x1c1a   :  { %v1910_v4 = vadd.f32 1.0, %v3133_v25 }
0x1c1c   :  { %3134 = vrcp.f32 %v1910_v4 }
0x1c29   :  { %v3135_v6 = vpop.eup %3134 }
0x1c2a   :  { %v1924_v11 = vsub.f32 1.0, %v3135_v6  ;;  %v1930_v17 = vmul.f32 %v3135_v6, %v3737_v27 }
0x1c46   :  { %v1915_v26 = vpop.permute.xlu1 %1914 }
0x1c47   :  { %v1917_v7 = vmul.f32 %v3135_v6, %v1915_v26 }
0x1c49   :  { %1919 = vrot.lane.b32.xlu1 %v1917_v7, %s3221_s24 }
0x1cbb   :  { %v1920_v8 = vpop.permute.xlu1 %1919 }
0x1cbc   :  { %v1922_v5 = vadd.f32 %v1920_v8, %v1830_v24  ;;  %v3900_v24 = vld [vmem:[%s4006_s9] sm:$0x1] }
0x1cbe   :  { %3136 = vtanh.f32 %v1922_v5 }
0x1ccb   :  { %v3137_v9 = vpop.eup %3136 }
0x1ccc   :  { %1926 = vrot.lane.b32.xlu0 %v3137_v9, %s3223_s16 }
0x1d3e   :  { %v1927_v16 = vpop.permute.xlu0 %1926 }
0x1d3f   :  { %v1929_v18 = vmul.f32 %v1927_v16, %v1924_v11 }
0x1d41   :  { %v3796_v19 = vadd.f32 %v1930_v17, %v1929_v18 }
0x1d43   :  { %v1932_v20 = vmax.f32 %v3796_v19, 0.0 }
0x1d45   :  { %1934 = vrot.lane.b32.xlu1 %v1932_v20, %s3223_s16 }
0x1db7   :  { %v1935_v21 = vpop.permute.xlu1 %1934 }
0x1db8   :  { %3008 = vmatmul.mubr.msk.f32.vlgmr.msra.gmra.mxu0 %vm72_vm0, %v1935_v21 }
0x1db9   :  { %3022 = vmatpush3.msra.mxu0 %v3804_v14  ;;  %3029 = vmatprep.mubr.msk.f32.mxu0 %vm3219_vm1, %v3218_v3 }
0x1dba   :  { %3023 = vmatprep.subr.mxu0 %v3218_v3 }
0x1dbb   :  { %3024 = vmatpush3.msra.mxu0 %v3813_v22 }
0x1dbc   :  { %3025 = vmatprep.subr.mxu0 %v3218_v3 }
0x1dbd   :  { %3026 = vmatpush3.msra.mxu0 %v3820_v10 }
0x1dbe   :  { %3027 = vmatprep.subr.mxu0 %v3218_v3 }
0x1dbf   :  { %3028 = vmatpush3.msra.mxu0 %v3827_v15 }
0x1dc0   :  { %3043 = vmatprep.subr.mxu0 %v3218_v3 }
0x1e78   :  { %v2004_v30 = vpop.f32.mrf.mxu0 }
0x1e79   :  { %v3832_v29 = vadd.f32 %v2004_v30, %v3511_v36 }
0x1e7a   :  { %v3009_v27 = vpop.f32.mrf.mxu0 }
0x1e7b   :  { %v2008_v34 = vsel %vm592_vm4, %v3832_v29, -inf }
0x1e7c   :  { %2009 = vmax.xlane.f32.xlu0 %v2008_v34 }
0x1f05   :  { %v3836_v39 = vpop.xlane.xlu0 %2009 }
0x1f06   :  { %vm2020_vm15 = vcmp.eq.f32.partialorder %v3832_v29, %v3836_v39 }
0x1f07   :  { %v2021_v28 = vsel %vm2020_vm15, %v3519_v41, 12 }
0x1f08   :  { %v2022_v43 = vsel %vm592_vm4, %v2021_v28, 2147483647 }
0x1f09   :  { %v2024_v44 = vshra.s32 %v2022_v43, 16  ;;  %v2023_v63 = vand.u32 65535, %v2022_v43 }
0x1f0b   :  { %v2026_v62 = vcvt.s32.f32 %v2024_v44  ;;  %v2025_v46 = vcvt.s32.f32 %v2023_v63 }
0x1f0d   :  { %2027 = vmin.xlane.f32.xlu1 %v2026_v62 }
0x1f96   :  { %v2028_v36 = vpop.xlane.xlu1 %2027 }
0x1f97   :  { %vm2029_vm2 = vcmp.eq.f32.partialorder %v2026_v62, %v2028_v36  ;;  %v2034_v51 = vcvt.f32.s32 %v2028_v36 }
0x1f98   :  { %v2030_v48 = vsel %vm2029_vm2, %v2025_v46, inf }
0x1f99   :  { %2031 = vmin.xlane.f32.xlu0 %v2030_v48  ;;  %v2035_v53 = vshll.u32 %v2034_v51, 16 }
0x1faf   :  { %2115 = vrot.lane.b32.xlu0 %v3796_v19, %s3223_s16 }
0x2022   :  { %v2032_v52 = vpop.xlane.xlu0 %2031 }
0x2023   :  { %v2033_v54 = vcvt.f32.s32 %v2032_v52 }
0x2025   :  { %v2036_v13 = vadd.s32 %v2035_v53, %v2033_v54 }
0x2026   :  { %v2116_v55 = vpop.permute.xlu0 %2115 }
0x2027   :  { %3086 = vpush %v2036_v13  ;;  %3030 = vmatmul.mubr.msk.f32.vlgmr.msra.gmra.mxu0 %vm72_vm0, %v2116_v55 }
0x2028   :  { %3044 = vmatpush3.msra.mxu0 %v3186_v56  ;;  %3051 = vmatprep.mubr.msk.f32.mxu0 %vm3219_vm1, %v3218_v3 }
0x2029   :  { %3045 = vmatprep.subr.mxu0 %v3218_v3 }
0x202a   :  { %3046 = vmatpush3.msra.mxu0 %v3187_v57 }
0x202b   :  { %3047 = vmatprep.subr.mxu0 %v3218_v3 }
0x202c   :  { %3048 = vmatpush3.msra.mxu0 %v3188_v58 }
0x202d   :  { %3049 = vmatprep.subr.mxu0 %v3218_v3 }
0x202e   :  { %3050 = vmatpush3.msra.mxu0 %v3189_v59 }
0x202f   :  { %3065 = vmatprep.subr.mxu0 %v3218_v3 }
0x2058   :  { %s3087_s7 = spop %3086 }
0x2059   :  { %s2038_s30 = scalar_lea.vmem %s3998_s1, %s3087_s7 }
0x205a   :  { %v2039_v45 = vld [vmem:[%s2038_s30] sm:$0x1] }
0x205b   :  { %3019 = vmatmul.mubr.msk.f32.vlgmr.msra.gmra.mxu1 %vm72_vm0, %v2039_v45 }
0x205c   :  { %3033 = vmatpush3.msra.mxu1 %v3870_v47  ;;  %3040 = vmatprep.mubr.msk.f32.mxu1 %vm3219_vm1, %v3218_v3 }
0x205d   :  { %3034 = vmatprep.subr.mxu1 %v3218_v3 }
0x205e   :  { %3035 = vmatpush3.msra.mxu1 %v3879_v49 }
0x205f   :  { %3036 = vmatprep.subr.mxu1 %v3218_v3 }
0x2060   :  { %3037 = vmatpush3.msra.mxu1 %v3886_v50 }
0x2061   :  { %3038 = vmatprep.subr.mxu1 %v3218_v3 }
0x2062   :  { %3039 = vmatpush3.msra.mxu1 %v3893_v23 }
0x2063   :  { %3054 = vmatprep.subr.mxu1 %v3218_v3 }
0x20e7   :  { %v2185_v0 = vpop.f32.mrf.mxu0 }
0x20e8   :  { %v2186_v1 = vadd.f32 %v3900_v24, %v2185_v0 }
0x20e9   :  { %v3031_v2 = vpop.f32.mrf.mxu0 }
0x20ea   :  { %2197 = vrot.lane.b32.xlu1 %v2186_v1, %s3221_s24 }
0x211b   :  { %v2109_v25 = vpop.f32.mrf.mxu1 }
0x211c   :  { %v2113_v6 = vadd.f32 %v2109_v25, %v3460_v12 }
0x211d   :  { %v3020_v4 = vpop.f32.mrf.mxu1 }
0x211e   :  { %v2189_v26 = vadd.f32 %v2186_v1, %v2113_v6 }
0x2120   :  { %v2638_v7 = vmul.f32 -1.442695, %v2189_v26 }
0x2122   :  { %3138 = vpow2.f32 %v2638_v7 }
0x212f   :  { %v3139_v8 = vpop.eup %3138 }
0x2130   :  { %v2193_v5 = vadd.f32 1.0, %v3139_v8 }
0x2132   :  { %3140 = vrcp.f32 %v2193_v5 }
0x213f   :  { %v3141_v9 = vpop.eup %3140 }
0x2140   :  { %v2207_v21 = vsub.f32 1.0, %v3141_v9  ;;  %v2213_v27 = vmul.f32 %v3141_v9, %v3796_v19 }
0x215c   :  { %v2198_v11 = vpop.permute.xlu1 %2197 }
0x215d   :  { %v2200_v16 = vmul.f32 %v3141_v9, %v2198_v11 }
0x215f   :  { %2202 = vrot.lane.b32.xlu1 %v2200_v16, %s3221_s24 }
0x21d1   :  { %v2203_v17 = vpop.permute.xlu1 %2202 }
0x21d2   :  { %v2205_v18 = vadd.f32 %v2203_v17, %v2113_v6 }
0x21d4   :  { %3142 = vtanh.f32 %v2205_v18  ;;  %v596_v18 = vsub.f32 %v3514_v38, %v3521_v42 }
0x21e1   :  { %v3143_v20 = vpop.eup %3142 }
0x21e2   :  { %2209 = vrot.lane.b32.xlu0 %v3143_v20, %s3223_s16  ;;  %v597_v20 = vmul.f32 1.442695, %v596_v18 }
0x2254   :  { %v2210_v30 = vpop.permute.xlu0 %2209 }
0x2255   :  { %v2212_v34 = vmul.f32 %v2210_v30, %v2207_v21  ;;  %v1445_v21 = vsub.f32 %v3694_v32, %v3698_v40 }
0x2257   :  { %v3908_v28 = vadd.f32 %v2213_v27, %v2212_v34  ;;  %v1446_v30 = vmul.f32 1.442695, %v1445_v21  ;;  %v2011_v27 = vsub.f32 %v3832_v29, %v3836_v39 }
0x2259   :  { %v2215_v43 = vmax.f32 %v3908_v28, 0.0  ;;  %v2012_v34 = vmul.f32 1.442695, %v2011_v27 }
0x225b   :  { %2217 = vrot.lane.b32.xlu1 %v2215_v43, %s3223_s16 }
0x22cd   :  { %v2218_v44 = vpop.permute.xlu1 %2217 }
0x22ce   :  { %3041 = vmatmul.mubr.msk.f32.vlgmr.msra.gmra.mxu1 %vm72_vm0, %v2218_v44 }
0x22cf   :  { %3055 = vmatpush3.msra.mxu1 %v3804_v14  ;;  %3062 = vmatprep.mubr.msk.f32.mxu1 %vm3219_vm1, %v3218_v3  ;;  %v3925_v14 = vld [vmem:[%s4008_s11] sm:$0x1] }
0x22d0   :  { %3056 = vmatprep.subr.mxu1 %v3218_v3 }
0x22d1   :  { %3057 = vmatpush3.msra.mxu1 %v3813_v22 }
0x22d2   :  { %3058 = vmatprep.subr.mxu1 %v3218_v3 }
0x22d3   :  { %3059 = vmatpush3.msra.mxu1 %v3820_v10 }
0x22d4   :  { %3060 = vmatprep.subr.mxu1 %v3218_v3 }
0x22d5   :  { %3061 = vmatpush3.msra.mxu1 %v3827_v15 }
0x238e   :  { %v2287_v19 = vpop.f32.mrf.mxu1 }
0x238f   :  { %v3928_v62 = vadd.f32 %v3925_v14, %v2287_v19 }
0x2390   :  { %v3042_v63 = vpop.f32.mrf.mxu1 }
0x2391   :  { %v2291_v22 = vsel %vm592_vm4, %v3928_v62, -inf }
0x2392   :  { %2292 = vmax.xlane.f32.xlu0 %v2291_v22 }
0x241b   :  { %v3932_v36 = vpop.xlane.xlu0 %2292 }
0x241c   :  { %vm2303_vm3 = vcmp.eq.f32.partialorder %v3928_v62, %v3932_v36 }
0x241d   :  { %v2304_v10 = vsel %vm2303_vm3, %v3519_v41, 12 }
0x241e   :  { %v2305_v15 = vsel %vm592_vm4, %v2304_v10, 2147483647 }
0x241f   :  { %v2307_v46 = vshra.s32 %v2305_v15, 16  ;;  %v2306_v51 = vand.u32 65535, %v2305_v15 }
0x2421   :  { %v2309_v48 = vcvt.s32.f32 %v2307_v46  ;;  %v2308_v53 = vcvt.s32.f32 %v2306_v51  ;;  %v879_v51 = vsub.f32 %v3576_v33, %v3580_v37 }
0x2423   :  { %2310 = vmin.xlane.f32.xlu1 %v2309_v48 }
0x24ac   :  { %v2311_v52 = vpop.xlane.xlu1 %2310 }
0x24ad   :  { %vm2312_vm5 = vcmp.eq.f32.partialorder %v2309_v48, %v2311_v52  ;;  %v2317_v13 = vcvt.f32.s32 %v2311_v52  ;;  %v880_v52 = vmul.f32 1.442695, %v879_v51 }
0x24ae   :  { %v2313_v54 = vsel %vm2312_vm5, %v2308_v53, inf  ;;  %v1162_v53 = vsub.f32 %v3635_v31, %v3639_v35 }
0x24af   :  { %2314 = vmin.xlane.f32.xlu0 %v2313_v54  ;;  %v2318_v56 = vshll.u32 %v2317_v13, 16  ;;  %v1728_v13 = vsub.f32 %v3753_v60, %v3757_v61 }
0x24b0   :  { %v1163_v54 = vmul.f32 1.442695, %v1162_v53 }
0x24c5   :  { %2398 = vrot.lane.b32.xlu0 %v3908_v28, %s3223_s16 }
0x2538   :  { %v2315_v55 = vpop.xlane.xlu0 %2314 }
0x2539   :  { %v2316_v57 = vcvt.f32.s32 %v2315_v55  ;;  %v1729_v55 = vmul.f32 1.442695, %v1728_v13 }
0x253b   :  { %v2319_v58 = vadd.s32 %v2318_v56, %v2316_v57  ;;  %v2294_v56 = vsub.f32 %v3928_v62, %v3932_v36 }
0x253c   :  { %v2399_v41 = vpop.permute.xlu0 %2398 }
0x253d   :  { %3088 = vpush %v2319_v58  ;;  %3063 = vmatmul.mubr.msk.f32.vlgmr.msra.gmra.mxu1 %vm72_vm0, %v2399_v41  ;;  %v2295_v57 = vmul.f32 1.442695, %v2294_v56 }
0x256e   :  { %s3089_s11 = spop %3088 }
0x256f   :  { %s2321_s8 = scalar_lea.vmem %s3998_s1, %s3089_s11  ;;  %s3224_s1 = smov [#allocation3]  }
0x2570   :  { %v2322_v59 = vld [vmem:[%s2321_s8] sm:$0x1] }
0x2571   :  { %3052 = vmatmul.mubr.msk.f32.vlgmr.msra.gmra.mxu0 %vm72_vm0, %v2322_v59 }
0x2572   :  { %3066 = vmatpush3.msra.mxu0 %v3870_v47  ;;  %3073 = vmatprep.mubr.msk.f32.mxu0 %vm3219_vm1, %v3218_v3 }
0x2573   :  { %3067 = vmatprep.subr.mxu0 %v3218_v3 }
0x2574   :  { %3068 = vmatpush3.msra.mxu0 %v3879_v49 }
0x2575   :  { %3069 = vmatprep.subr.mxu0 %v3218_v3 }
0x2576   :  { %3070 = vmatpush3.msra.mxu0 %v3886_v50 }
0x2577   :  { %3071 = vmatprep.subr.mxu0 %v3218_v3 }
0x2578   :  { %3072 = vmatpush3.msra.mxu0 %v3893_v23 }
0x25fd   :  { %v2468_v45 = vpop.f32.mrf.mxu1 }
0x25fe   :  { %v2469_v0 = vadd.f32 %v3900_v24, %v2468_v45 }
0x25ff   :  { %v3064_v1 = vpop.f32.mrf.mxu1 }
0x2600   :  { %2480 = vrot.lane.b32.xlu1 %v2469_v0, %s3221_s24 }
0x2631   :  { %v2392_v47 = vpop.f32.mrf.mxu0 }
0x2632   :  { %v2396_v25 = vadd.f32 %v2392_v47, %v3460_v12 }
0x2633   :  { %v3053_v2 = vpop.f32.mrf.mxu0 }
0x2634   :  { %v2472_v4 = vadd.f32 %v2469_v0, %v2396_v25 }
0x2636   :  { %v2642_v49 = vmul.f32 -1.442695, %v2472_v4 }
0x2638   :  { %3144 = vpow2.f32 %v2642_v49 }
0x2645   :  { %v3145_v6 = vpop.eup %3144 }
0x2646   :  { %v2476_v26 = vadd.f32 1.0, %v3145_v6 }
0x2648   :  { %3146 = vrcp.f32 %v2476_v26 }
0x2655   :  { %v3147_v50 = vpop.eup %3146 }
0x2656   :  { %v2490_v5 = vsub.f32 1.0, %v3147_v50  ;;  %v2496_v12 = vmul.f32 %v3147_v50, %v3908_v28 }
0x2672   :  { %v2481_v3 = vpop.permute.xlu1 %2480 }
0x2673   :  { %v2483_v7 = vmul.f32 %v3147_v50, %v2481_v3 }
0x2675   :  { %2485 = vrot.lane.b32.xlu1 %v2483_v7, %s3221_s24  ;;  %s2592_s24 = sshll.u32 %s3224_s1, 4  ;;  %s2593_s24 = int_to_ptr.vmem [resolvable:$true] %s2592_s24 }
0x2676   :  { %p3201_p1 = scmp.lt.s32.totalorder %s2593_s24, %s2593_s24 }
0x26e7   :  { %v2486_v23 = vpop.permute.xlu1 %2485 }
0x26e8   :  { %v2488_v24 = vadd.f32 %v2486_v23, %v2396_v25 }
0x26ea   :  { %3148 = vtanh.f32 %v2488_v24 }
0x26eb   :  { %3150 = vpow2.f32 %v597_v20 }
0x26ec   :  { %3152 = vpow2.f32 %v1446_v30 }
0x26ed   :  { %3154 = vpow2.f32 %v2012_v34 }
0x26f7   :  { %v3149_v8 = vpop.eup %3148 }
0x26f8   :  { %2492 = vrot.lane.b32.xlu0 %v3149_v8, %s3223_s16  ;;  %v3151_v28 = vpop.eup %3150 }
0x26f9   :  { %v599_v43 = vsel %vm592_vm4, %v3151_v28, 0.0  ;;  %v3153_v44 = vpop.eup %3152 }
0x26fa   :  { %v1448_v19 = vsel %vm592_vm4, %v3153_v44, 0.0  ;;  %v3155_v38 = vpop.eup %3154 }
0x26fb   :  { %v2014_v42 = vsel %vm592_vm4, %v3155_v38, 0.0 }
0x276a   :  { %v2493_v9 = vpop.permute.xlu0 %2492 }
0x276b   :  { %v2495_v11 = vmul.f32 %v2493_v9, %v2490_v5 }
0x276d   :  { %v2497_v16 = vadd.f32 %v2496_v12, %v2495_v11 }
0x276f   :  { %v2498_v17 = vmax.f32 %v2497_v16, 0.0 }
0x2771   :  { %2500 = vrot.lane.b32.xlu1 %v2498_v17, %s3223_s16  ;;  %s3196_s16 = scalar_lea.vmem %s2593_s24, 128 }
0x2772   :  { %p3197_p0 = scmp.ne.s32.totalorder %s2593_s24, %s3196_s16  ;;  %p3202_p2 = scmp.lt.s32.totalorder %s3196_s16, %s3196_s16 }
0x2774   :  { %p3203_p3 = por %p3202_p2, %p3201_p1 }
0x2776   :  { %p3204_p4 = pnand %p3203_p3, %p3197_p0 }
0x2795   :  { %600 = vadd.xlane.f32.xlu1 %v599_v43 }
0x2799   :  { %1449 = vadd.xlane.f32.xlu1 %v1448_v19 }
0x279d   :  { %2015 = vadd.xlane.f32.xlu1 %v2014_v42 }
0x27e3   :  { %v2501_v32 = vpop.permute.xlu1 %2500 }
0x27e4   :  { %3074 = vmatmul.mubr.msk.f32.vlgmr.msra.gmra.mxu0 %vm72_vm0, %v2501_v32 }
0x281e   :  { %v601_v40 = vpop.xlane.xlu1 %600 }
0x281f   :  { %3156 = vrcp.f32 %v601_v40 }
0x2822   :  { %v1450_v29 = vpop.xlane.xlu1 %1449 }
0x2823   :  { %3158 = vrcp.f32 %v1450_v29 }
0x2826   :  { %v2016_v39 = vpop.xlane.xlu1 %2015 }
0x2827   :  { %3160 = vrcp.f32 %v2016_v39 }
0x2828   :  { %3162 = vpow2.f32 %v880_v52 }
0x2829   :  { %3164 = vpow2.f32 %v1163_v54 }
0x282a   :  { %3166 = vpow2.f32 %v1729_v55 }
0x282b   :  { %3168 = vpow2.f32 %v2295_v57 }
0x282c   :  { %v3157_v63 = vpop.eup %3156 }
0x282d   :  { %v603_v22 = vmul.f32 %v3157_v63, %v3151_v28 }
0x282f   :  { %604 = vst.msk [vmem:[#allocation3] sm:$0x1] %vm592_vm4, %v603_v22 }
0x2830   :  { %v3159_v10 = vpop.eup %3158 }
0x2831   :  { %v1452_v15 = vmul.f32 %v3159_v10, %v3153_v44 }
0x2833   :  { %1453 = vst.msk [vmem:[#allocation3 + $0x3] sm:$0x1] %vm592_vm4, %v1452_v15 }
0x2834   :  { %v3161_v46 = vpop.eup %3160 }
0x2835   :  { %v2018_v48 = vmul.f32 %v3161_v46, %v3155_v38  ;;  %v3163_v31 = vpop.eup %3162 }
0x2836   :  { %v882_v35 = vsel %vm592_vm4, %v3163_v31, 0.0  ;;  %v3165_v59 = vpop.eup %3164 }
0x2837   :  { %2019 = vst.msk [vmem:[#allocation3 + $0x5] sm:$0x1] %vm592_vm4, %v2018_v48  ;;  %v1165_v60 = vsel %vm592_vm4, %v3165_v59, 0.0  ;;  %v3167_v61 = vpop.eup %3166 }
0x2838   :  { %v1731_v62 = vsel %vm592_vm4, %v3167_v61, 0.0  ;;  %v3169_v36 = vpop.eup %3168 }
0x28a4   :  { %v2570_v58 = vpop.f32.mrf.mxu0 }
0x28a5   :  { %v2571_v41 = vadd.f32 %v3925_v14, %v2570_v58  ;;  %v2297_v14 = vsel %vm592_vm4, %v3169_v36, 0.0 }
0x28a6   :  { %v3075_v33 = vpop.f32.mrf.mxu0 }
0x28a7   :  { %v2574_v37 = vsel %vm592_vm4, %v2571_v41, -inf }
0x28a8   :  { %2575 = vmax.xlane.f32.xlu0 %v2574_v37 }
0x28ac   :  { %883 = vadd.xlane.f32.xlu0 %v882_v35 }
0x28b0   :  { %1166 = vadd.xlane.f32.xlu0 %v1165_v60 }
0x28b4   :  { %1732 = vadd.xlane.f32.xlu0 %v1731_v62 }
0x28b8   :  { %2298 = vadd.xlane.f32.xlu0 %v2297_v14 }
0x2931   :  { %v2576_v45 = vpop.xlane.xlu0 %2575 }
0x2932   :  { %v2577_v0 = vsub.f32 %v2571_v41, %v2576_v45 }
0x2934   :  { %v2578_v1 = vmul.f32 1.442695, %v2577_v0 }
0x2935   :  { %v884_v47 = vpop.xlane.xlu0 %883 }
0x2936   :  { %3170 = vpow2.f32 %v2578_v1 }
0x2937   :  { %3172 = vrcp.f32 %v884_v47 }
0x2939   :  { %v1167_v2 = vpop.xlane.xlu0 %1166 }
0x293a   :  { %3174 = vrcp.f32 %v1167_v2 }
0x293d   :  { %v1733_v25 = vpop.xlane.xlu0 %1732 }
0x293e   :  { %3176 = vrcp.f32 %v1733_v25 }
0x2941   :  { %v2299_v4 = vpop.xlane.xlu0 %2298 }
0x2942   :  { %3178 = vrcp.f32 %v2299_v4 }
0x2943   :  { %v3171_v49 = vpop.eup %3170 }
0x2944   :  { %v3173_v6 = vpop.eup %3172  ;;  %v2580_v26 = vsel %vm592_vm4, %v3171_v49, 0.0 }
0x2945   :  { %v886_v50 = vmul.f32 %v3173_v6, %v3163_v31  ;;  %2581 = vadd.xlane.f32.xlu1 %v2580_v26 }
0x2947   :  { %v3175_v3 = vpop.eup %3174  ;;  %887 = vst.msk [vmem:[#allocation3 + $0x1] sm:$0x1] %vm592_vm4, %v886_v50 }
0x2948   :  { %v1169_v7 = vmul.f32 %v3175_v3, %v3165_v59 }
0x294a   :  { %1170 = vst.msk [vmem:[#allocation3 + $0x2] sm:$0x1] %vm592_vm4, %v1169_v7 }
0x294b   :  { %v3177_v23 = vpop.eup %3176 }
0x294c   :  { %v1735_v24 = vmul.f32 %v3177_v23, %v3167_v61 }
0x294e   :  { %1736 = vst.msk [vmem:[#allocation3 + $0x4] sm:$0x1] %vm592_vm4, %v1735_v24 }
0x294f   :  { %v3179_v8 = vpop.eup %3178 }
0x2950   :  { %v2301_v5 = vmul.f32 %v3179_v8, %v3169_v36 }
0x2952   :  { %2302 = vst.msk [vmem:[#allocation3 + $0x6] sm:$0x1] %vm592_vm4, %v2301_v5 }
0x29ce   :  { %v2582_v9 = vpop.xlane.xlu1 %2581 }
0x29cf   :  { %3180 = vrcp.f32 %v2582_v9 }
0x29dc   :  { %v3181_v12 = vpop.eup %3180 }
0x29dd   :  { %v2584_v11 = vmul.f32 %v3181_v12, %v3171_v49 }
0x29df   :  { %2585 = vst.msk [vmem:[#allocation3 + $0x7] sm:$0x1] %vm592_vm4, %v2584_v11 }
0x29e0   :  { %3207 = shalt.err (!%p3204_p4)
}
0x29e1   :  { %2595 = dma.vmem_to_hbm [thread:$0]  %s2593_s24, 128, %s4009_s12, [#allocation4]  }
0x29e2   :  { %3216 = dma.done.wait [#allocation4], 128  }
0x29e3   :  { %3217 = vsyncadd [#allocation4], 4294967168 }
0x29e4   :  { %2599 = vsyncpa [#allocation4], 1 }

</bundles_post_ra>
